<compile_context>
chip_gen: v7x
topology: tpu7x:2x2x1
jax: 0.10.0
libtpu: 0.0.40
codegen_flags: <defaults>
</compile_context>

<pallas_src>
import math

import jax
import jax.numpy as jnp
from jax.experimental import pallas as pl
from jax.experimental.pallas import tpu as pltpu


# --------------------------------------------------------------------------- kernel
def qa_sim_kernel(x1_ref, x2_ref, sts_ref,
                  w1_ref, b1_ref, w2_ref, b2_ref, w3_ref, b3_ref,
                  wl_ref, bl_ref, out_ref):
    """One grid step = tile_b batch elements (both streams).

    x*_ref : [1, tile_b, S, E]  input dtype (cast to bf16 in-kernel)
    sts_ref: [1, tile_b, 1]     f32 STS logits
    w*_ref : resident bf16 weights, laid out [in, out]; b*_ref: f32 [1, out]
    wl/bl  : SMEM scalars of the 2->1 head
    out_ref: [1, tile_b, 1]     f32
    """
    _, tb, s, e = x1_ref.shape
    hp = w1_ref.shape[1]
    rows = tb * s

    def mlp_pool(x_ref):
        # Layers 1 & 2 on [tile_b*S, E] rows; bf16 MXU operands, f32 accum.
        x = x_ref[...].astype(jnp.bfloat16).reshape(rows, e)
        h = jnp.dot(x, w1_ref[...], preferred_element_type=jnp.float32)
        h = jnp.maximum(h + b1_ref[...], 0.0).astype(jnp.bfloat16)
        h = jnp.dot(h, w2_ref[...], preferred_element_type=jnp.float32)
        h = jnp.maximum(h + b2_ref[...], 0.0)                       # [rows, Hp] f32
        # Mean-pool over the sequence BEFORE layer 3 (valid by linearity).
        pooled = jnp.mean(h.reshape(tb, s, hp), axis=1)             # [tb, Hp] f32
        return jnp.dot(pooled.astype(jnp.bfloat16), w3_ref[...],
                       preferred_element_type=jnp.float32) + b3_ref[...]   # [tb, E]

    e1 = mlp_pool(x1_ref)
    e2 = mlp_pool(x2_ref)

    # Cosine similarity (F.cosine_similarity, eps=1e-8); rsqrt goes to the EUP.
    eps2 = jnp.float32(1e-16)       # max(sqrt(x), eps) == sqrt(max(x, eps^2))
    dot12 = jnp.sum(e1 * e2, axis=-1, keepdims=True)                # [tb, 1]
    sq1 = jnp.maximum(jnp.sum(e1 * e1, axis=-1, keepdims=True), eps2)
    sq2 = jnp.maximum(jnp.sum(e2 * e2, axis=-1, keepdims=True), eps2)
    cos = dot12 * jax.lax.rsqrt(sq1 * sq2)                          # [tb, 1]

    sts = jax.nn.sigmoid(sts_ref[...]).reshape(tb, 1)               # [tb, 1]

    # 2->1 head: two VPU FMAs with SMEM scalars (no concat, no tiny matmul).
    res = cos * wl_ref[0] + sts * wl_ref[1] + bl_ref[0]
    out_ref[...] = res.reshape(1, tb, 1)


# --------------------------------------------------------------------------- helpers
def _round_up(x, m):
    return (x + m - 1) // m * m


def _vmem_plan():
    """Generation-aware vmem_limit_bytes."""
    cap = 64 * 1024 * 1024
    try:
        cap = int(pltpu.get_tpu_info().vmem_capacity_bytes)
    except Exception:
        pass
    if cap <= 64 * 1024 * 1024:
        # v7x-class (64 MiB physical): leave headroom for internal scratch.
        limit = min(40 * 1024 * 1024, int(cap * 0.625))
    else:
        # v5e / v6e class (128 MiB physical).
        limit = int(cap * 0.75)
    return limit


def _choose_tile_b(B, S, E, H, vmem_limit):
    """Pick the batch tile from the VMEM budget and MXU/DMA sweet spot."""
    Hp = _round_up(H, 128)
    E_lane = _round_up(E, 128)
    # Resident weights (budgeted double-buffered so the non-Buffered(1)
    # fallback path also fits), bf16.
    w_bytes = 2 * 2 * (_round_up(E, 16) * Hp + Hp * Hp + Hp * E_lane)
    # Per-batch-element bytes:
    #   2 streams x 2 pipeline buffers x S x E_lane x 4B (f32 activations)
    #   + live hidden temporaries (~8B per (row, Hp) element, one stream at
    #     a time).
    per_b = 2 * 2 * S * E_lane * 4 + 8 * S * Hp
    budget = int(vmem_limit * 0.85) - w_bytes - (2 << 20)
    tile_b = max(1, budget // per_b)
    # ~0.5K-2K matmul rows per stream per step is the sweet spot; beyond that
    # (esp. on v5e) extra tile size only adds VMEM/vreg pressure.
    tile_b = min(tile_b, max(1, 2048 // max(S, 1)))
    # Keep >= 2 grid steps so v7x's two TensorCores both get work.
    if B >= 2:
        tile_b = min(tile_b, -(-B // 2))
    # Keep tile_b * S a multiple of 8 so in-kernel reshapes are layout no-ops.
    step = 8 // math.gcd(S, 8)
    if tile_b >= step:
        tile_b = (tile_b // step) * step
    tile_b = max(tile_b, 1)
    # Prefer a tile that divides B exactly (avoids a batch-padding pass), as
    # long as it does not shrink the tile by more than 2x.
    for cand in range(tile_b, 0, -1):
        if B % cand == 0 and cand * 2 >= tile_b and (cand * S) % 8 == 0:
            return cand
    return tile_b


def prepare_params(params):
    """Call-invariant weight prep (pad + transpose to [in, out] + bf16 cast).

    Do this ONCE and reuse the result across forwards.
    """
    H, E = params["w1"].shape
    Hp = _round_up(H, 128)

    def padded_t(w, out_dim, in_dim):
        w = jnp.pad(w, ((0, out_dim - w.shape[0]), (0, in_dim - w.shape[1])))
        return w.T.astype(jnp.bfloat16)              # [in, out]

    return {
        "w1": padded_t(params["w1"], Hp, E),          # [E,  Hp]
        "w2": padded_t(params["w2"], Hp, Hp),         # [Hp, Hp]
        "w3": padded_t(params["w3"], E, Hp),          # [Hp, E ]
        "b1": jnp.pad(params["b1"], (0, Hp - H)).reshape(1, Hp).astype(jnp.float32),
        "b2": jnp.pad(params["b2"], (0, Hp - H)).reshape(1, Hp).astype(jnp.float32),
        "b3": params["b3"].reshape(1, E).astype(jnp.float32),
        "wl": params["wl"].reshape(-1).astype(jnp.float32),   # (2,)  SMEM
        "bl": params["bl"].reshape(-1).astype(jnp.float32),   # (1,)  SMEM
    }


# --------------------------------------------------------------------------- wrapper
def qa_pair_similarity(emb1, emb2, sts_logits, prep, *, tile_b=None):
    """emb1/emb2: [B,S,E] BERT last hidden states; sts_logits: [B,1]."""
    B, S, E = emb1.shape
    Hp = prep["w1"].shape[1]

    vmem_limit = _vmem_plan()
    if tile_b is None:
        tile_b = _choose_tile_b(B, S, E, Hp, vmem_limit)
    tile_b = max(1, min(tile_b, B))

    Bp = _round_up(B, tile_b)
    nt = Bp // tile_b

    sts = sts_logits.astype(jnp.float32)
    if Bp != B:
        pad3 = ((0, Bp - B), (0, 0), (0, 0))
        emb1 = jnp.pad(emb1, pad3)
        emb2 = jnp.pad(emb2, pad3)
        sts = jnp.pad(sts, ((0, Bp - B), (0, 0)))

    # Leading-dim splits are layout no-ops; no extra HBM pass over activations.
    x1 = emb1.reshape(nt, tile_b, S, E)
    x2 = emb2.reshape(nt, tile_b, S, E)
    sts = sts.reshape(nt, tile_b, 1)

    def _call(buffered_weights):
        def resident(shape):
            nd = len(shape)
            if buffered_weights:
                return pl.BlockSpec(shape, lambda i: (0,) * nd,
                                    pipeline_mode=pl.Buffered(1))
            return pl.BlockSpec(shape, lambda i: (0,) * nd)

        in_specs = [
            pl.BlockSpec((1, tile_b, S, E), lambda i: (i, 0, 0, 0)),
            pl.BlockSpec((1, tile_b, S, E), lambda i: (i, 0, 0, 0)),
            pl.BlockSpec((1, tile_b, 1), lambda i: (i, 0, 0)),
            resident(prep["w1"].shape),
            resident(prep["b1"].shape),
            resident(prep["w2"].shape),
            resident(prep["b2"].shape),
            resident(prep["w3"].shape),
            resident(prep["b3"].shape),
            pl.BlockSpec(memory_space=pltpu.MemorySpace.SMEM),
            pl.BlockSpec(memory_space=pltpu.MemorySpace.SMEM),
        ]
        return pl.pallas_call(
            qa_sim_kernel,
            out_shape=jax.ShapeDtypeStruct((nt, tile_b, 1), jnp.float32),
            grid=(nt,),
            in_specs=in_specs,
            out_specs=pl.BlockSpec((1, tile_b, 1), lambda i: (i, 0, 0)),
            compiler_params=pltpu.CompilerParams(
                dimension_semantics=("parallel",),
                vmem_limit_bytes=vmem_limit,
            ),
        )(x1, x2, sts, prep["w1"], prep["b1"], prep["w2"], prep["b2"],
          prep["w3"], prep["b3"], prep["wl"], prep["bl"])

    try:
        out = _call(buffered_weights=True)      # single-buffered resident weights
    except Exception:
        out = _call(buffered_weights=False)     # fallback: default double-buffering

    return out.reshape(Bp, 1)[:B]


# --------------------------------------------------------------------------- reference
def reference(emb1, emb2, sts_logits, params):
    """Pure-JAX f32 reference mirroring the PyTorch forward (post-BERT part)."""
    def lin(x, w, b):
        return x @ w.T + b

    def mlp(x):
        h = jax.nn.relu(lin(x, params["w1"], params["b1"]))
        h = jax.nn.relu(lin(h, params["w2"], params["b2"]))
        return lin(h, params["w3"], params["b3"])

    e1 = mlp(emb1).mean(axis=1)
    e2 = mlp(emb2).mean(axis=1)
    eps = 1e-8
    n1 = jnp.maximum(jnp.linalg.norm(e1, axis=-1), eps)
    n2 = jnp.maximum(jnp.linalg.norm(e2, axis=-1), eps)
    cos = jnp.sum(e1 * e2, axis=-1) / (n1 * n2)
    sts = jax.nn.sigmoid(sts_logits).reshape(-1)
    stacked = jnp.stack([cos, sts], axis=1)
    return lin(stacked, params["wl"], params["bl"])


def init_params(key, embedding_dim, hidden_dim):
    """Deterministic PyTorch-Linear-style init (uniform +- 1/sqrt(fan_in))."""
    ks = jax.random.split(key, 8)

    def u(k, shape, fan_in):
        bound = 1.0 / jnp.sqrt(jnp.float32(fan_in))
        return jax.random.uniform(k, shape, jnp.float32, -bound, bound)

    return {
        "w1": u(ks[0], (hidden_dim, embedding_dim), embedding_dim),
        "b1": u(ks[1], (hidden_dim,), embedding_dim),
        "w2": u(ks[2], (hidden_dim, hidden_dim), hidden_dim),
        "b2": u(ks[3], (hidden_dim,), hidden_dim),
        "w3": u(ks[4], (embedding_dim, hidden_dim), hidden_dim),
        "b3": u(ks[5], (embedding_dim,), hidden_dim),
        "wl": u(ks[6], (1, 2), 2),
        "bl": u(ks[7], (1,), 2),
    }


if __name__ == "__main__":
    # Small shapes; batch chosen so the auto-tiler produces a multi-step grid.
    B, S, E, H = 16, 8, 32, 32
    key = jax.random.PRNGKey(0)
    k_emb1, k_emb2, k_sts, k_par = jax.random.split(key, 4)

    # Stand-ins for BERT outputs (see TODO at top of file).
    emb1 = jax.random.normal(k_emb1, (B, S, E), jnp.float32)
    emb2 = jax.random.normal(k_emb2, (B, S, E), jnp.float32)
    sts_logits = jax.random.normal(k_sts, (B, 1), jnp.float32)

    params = init_params(k_par, E, H)
    prep = prepare_params(params)      # hoisted, cached across forwards

    pred = qa_pair_similarity(emb1, emb2, sts_logits, prep)
    pred = jax.block_until_ready(pred)

    ref = reference(emb1, emb2, sts_logits, params)
    assert pred.shape == (B, 1)
    # bf16 MXU operands + pool-before-layer-3 reorder => loosened tolerance.
    assert jnp.allclose(pred, ref, atol=5e-2, rtol=5e-2), (
        jnp.max(jnp.abs(pred - ref)), pred, ref)

    print("KERNEL_OK")
</pallas_src>

<mosaic_0001>
module attributes {stable_mosaic.version = 11 : i64} {
  func.func @qa_sim_kernel(%arg0: i32, %arg1: memref<1x8x8x32xf32, #tpu.memory_space<vmem>>, %arg2: memref<1x8x8x32xf32, #tpu.memory_space<vmem>>, %arg3: memref<1x8x1xf32, #tpu.memory_space<vmem>>, %arg4: memref<32x128xbf16, #tpu.memory_space<vmem>>, %arg5: memref<1x128xf32, #tpu.memory_space<vmem>>, %arg6: memref<128x128xbf16, #tpu.memory_space<vmem>>, %arg7: memref<1x128xf32, #tpu.memory_space<vmem>>, %arg8: memref<128x32xbf16, #tpu.memory_space<vmem>>, %arg9: memref<1x32xf32, #tpu.memory_space<vmem>>, %arg10: memref<2xf32, #tpu.memory_space<smem>>, %arg11: memref<1xf32, #tpu.memory_space<smem>>, %arg12: memref<1x8x1xf32, #tpu.memory_space<vmem>>) attributes {dimension_semantics = [#tpu.dimension_semantics<parallel>], iteration_bounds = array<i64: 2>, scalar_prefetch = 0 : i64, scratch_operands = 0 : i64, tpu.core_type = #tpu.core_type<tc>, window_params = [{transform_indices = @transform_0, window_bounds = array<i64: 1, 8, 8, 32>}, {transform_indices = @transform_1, window_bounds = array<i64: 1, 8, 8, 32>}, {transform_indices = @transform_2, window_bounds = array<i64: 1, 8, 1>}, {pipeline_mode = #tpu.pipeline_mode<synchronous>, transform_indices = @transform_3, window_bounds = array<i64: 32, 128>}, {pipeline_mode = #tpu.pipeline_mode<synchronous>, transform_indices = @transform_4, window_bounds = array<i64: 1, 128>}, {pipeline_mode = #tpu.pipeline_mode<synchronous>, transform_indices = @transform_5, window_bounds = array<i64: 128, 128>}, {pipeline_mode = #tpu.pipeline_mode<synchronous>, transform_indices = @transform_6, window_bounds = array<i64: 1, 128>}, {pipeline_mode = #tpu.pipeline_mode<synchronous>, transform_indices = @transform_7, window_bounds = array<i64: 128, 32>}, {pipeline_mode = #tpu.pipeline_mode<synchronous>, transform_indices = @transform_8, window_bounds = array<i64: 1, 32>}, {transform_indices = @transform_9, window_bounds = array<i64: 2>}, {transform_indices = @transform_10, window_bounds = array<i64: 1>}, {transform_indices = @transform_11, window_bounds = array<i64: 1, 8, 1>}]} {
    %c0 = arith.constant 0 : index
    %c0_0 = arith.constant 0 : index
    %c0_1 = arith.constant 0 : index
    %c0_2 = arith.constant 0 : index
    %0 = vector.load %arg1[%c0, %c0_0, %c0_1, %c0_2] : memref<1x8x8x32xf32, #tpu.memory_space<vmem>>, vector<1x8x8x32xf32>
    %1 = arith.truncf %0 : vector<1x8x8x32xf32> to vector<1x8x8x32xbf16>
    %2 = vector.shape_cast %1 : vector<1x8x8x32xbf16> to vector<64x32xbf16>
    %c0_3 = arith.constant 0 : index
    %c0_4 = arith.constant 0 : index
    %3 = vector.load %arg4[%c0_3, %c0_4] : memref<32x128xbf16, #tpu.memory_space<vmem>>, vector<32x128xbf16>
    %cst = arith.constant dense<0.000000e+00> : vector<64x128xf32>
    %4 = tpu.matmul %2, %3, %cst {dimension_numbers = #tpu.dot_dimension_numbers<[1], [0], [0], [1], [0, 0, 1, 1], [], []>} : vector<64x32xbf16>, vector<32x128xbf16>, vector<64x128xf32> -> vector<64x128xf32>
    %c0_5 = arith.constant 0 : index
    %c0_6 = arith.constant 0 : index
    %5 = vector.load %arg5[%c0_5, %c0_6] : memref<1x128xf32, #tpu.memory_space<vmem>>, vector<1x128xf32>
    %6 = vector.broadcast %5 : vector<1x128xf32> to vector<64x128xf32>
    %7 = arith.addf %4, %6 : vector<64x128xf32>
    %cst_7 = arith.constant 0.000000e+00 : f32
    %8 = vector.broadcast %cst_7 : f32 to vector<64x128xf32>
    %9 = arith.maximumf %7, %8 : vector<64x128xf32>
    %10 = arith.truncf %9 : vector<64x128xf32> to vector<64x128xbf16>
    %c0_8 = arith.constant 0 : index
    %c0_9 = arith.constant 0 : index
    %11 = vector.load %arg6[%c0_8, %c0_9] : memref<128x128xbf16, #tpu.memory_space<vmem>>, vector<128x128xbf16>
    %cst_10 = arith.constant dense<0.000000e+00> : vector<64x128xf32>
    %12 = tpu.matmul %10, %11, %cst_10 {dimension_numbers = #tpu.dot_dimension_numbers<[1], [0], [0], [1], [0, 0, 1, 1], [], []>} : vector<64x128xbf16>, vector<128x128xbf16>, vector<64x128xf32> -> vector<64x128xf32>
    %c0_11 = arith.constant 0 : index
    %c0_12 = arith.constant 0 : index
    %13 = vector.load %arg7[%c0_11, %c0_12] : memref<1x128xf32, #tpu.memory_space<vmem>>, vector<1x128xf32>
    %14 = vector.broadcast %13 : vector<1x128xf32> to vector<64x128xf32>
    %15 = arith.addf %12, %14 : vector<64x128xf32>
    %cst_13 = arith.constant 0.000000e+00 : f32
    %16 = vector.broadcast %cst_13 : f32 to vector<64x128xf32>
    %17 = arith.maximumf %15, %16 : vector<64x128xf32>
    %18 = vector.shape_cast %17 : vector<64x128xf32> to vector<8x8x128xf32>
    %cst_14 = arith.constant dense<0.000000e+00> : vector<8x128xf32>
    %19 = vector.multi_reduction <add>, %18, %cst_14 [1] : vector<8x8x128xf32> to vector<8x128xf32>
    %cst_15 = arith.constant 8.000000e+00 : f32
    %20 = vector.broadcast %cst_15 : f32 to vector<8x128xf32>
    %21 = arith.divf %19, %20 : vector<8x128xf32>
    %22 = arith.truncf %21 : vector<8x128xf32> to vector<8x128xbf16>
    %c0_16 = arith.constant 0 : index
    %c0_17 = arith.constant 0 : index
    %23 = vector.load %arg8[%c0_16, %c0_17] : memref<128x32xbf16, #tpu.memory_space<vmem>>, vector<128x32xbf16>
    %cst_18 = arith.constant dense<0.000000e+00> : vector<8x32xf32>
    %24 = tpu.matmul %22, %23, %cst_18 {dimension_numbers = #tpu.dot_dimension_numbers<[1], [0], [0], [1], [0, 0, 1, 1], [], []>} : vector<8x128xbf16>, vector<128x32xbf16>, vector<8x32xf32> -> vector<8x32xf32>
    %c0_19 = arith.constant 0 : index
    %c0_20 = arith.constant 0 : index
    %25 = vector.load %arg9[%c0_19, %c0_20] : memref<1x32xf32, #tpu.memory_space<vmem>>, vector<1x32xf32>
    %26 = vector.broadcast %25 : vector<1x32xf32> to vector<8x32xf32>
    %27 = arith.addf %24, %26 : vector<8x32xf32>
    %c0_21 = arith.constant 0 : index
    %c0_22 = arith.constant 0 : index
    %c0_23 = arith.constant 0 : index
    %c0_24 = arith.constant 0 : index
    %28 = vector.load %arg2[%c0_21, %c0_22, %c0_23, %c0_24] : memref<1x8x8x32xf32, #tpu.memory_space<vmem>>, vector<1x8x8x32xf32>
    %29 = arith.truncf %28 : vector<1x8x8x32xf32> to vector<1x8x8x32xbf16>
    %30 = vector.shape_cast %29 : vector<1x8x8x32xbf16> to vector<64x32xbf16>
    %c0_25 = arith.constant 0 : index
    %c0_26 = arith.constant 0 : index
    %31 = vector.load %arg4[%c0_25, %c0_26] : memref<32x128xbf16, #tpu.memory_space<vmem>>, vector<32x128xbf16>
    %cst_27 = arith.constant dense<0.000000e+00> : vector<64x128xf32>
    %32 = tpu.matmul %30, %31, %cst_27 {dimension_numbers = #tpu.dot_dimension_numbers<[1], [0], [0], [1], [0, 0, 1, 1], [], []>} : vector<64x32xbf16>, vector<32x128xbf16>, vector<64x128xf32> -> vector<64x128xf32>
    %c0_28 = arith.constant 0 : index
    %c0_29 = arith.constant 0 : index
    %33 = vector.load %arg5[%c0_28, %c0_29] : memref<1x128xf32, #tpu.memory_space<vmem>>, vector<1x128xf32>
    %34 = vector.broadcast %33 : vector<1x128xf32> to vector<64x128xf32>
    %35 = arith.addf %32, %34 : vector<64x128xf32>
    %cst_30 = arith.constant 0.000000e+00 : f32
    %36 = vector.broadcast %cst_30 : f32 to vector<64x128xf32>
    %37 = arith.maximumf %35, %36 : vector<64x128xf32>
    %38 = arith.truncf %37 : vector<64x128xf32> to vector<64x128xbf16>
    %c0_31 = arith.constant 0 : index
    %c0_32 = arith.constant 0 : index
    %39 = vector.load %arg6[%c0_31, %c0_32] : memref<128x128xbf16, #tpu.memory_space<vmem>>, vector<128x128xbf16>
    %cst_33 = arith.constant dense<0.000000e+00> : vector<64x128xf32>
    %40 = tpu.matmul %38, %39, %cst_33 {dimension_numbers = #tpu.dot_dimension_numbers<[1], [0], [0], [1], [0, 0, 1, 1], [], []>} : vector<64x128xbf16>, vector<128x128xbf16>, vector<64x128xf32> -> vector<64x128xf32>
    %c0_34 = arith.constant 0 : index
    %c0_35 = arith.constant 0 : index
    %41 = vector.load %arg7[%c0_34, %c0_35] : memref<1x128xf32, #tpu.memory_space<vmem>>, vector<1x128xf32>
    %42 = vector.broadcast %41 : vector<1x128xf32> to vector<64x128xf32>
    %43 = arith.addf %40, %42 : vector<64x128xf32>
    %cst_36 = arith.constant 0.000000e+00 : f32
    %44 = vector.broadcast %cst_36 : f32 to vector<64x128xf32>
    %45 = arith.maximumf %43, %44 : vector<64x128xf32>
    %46 = vector.shape_cast %45 : vector<64x128xf32> to vector<8x8x128xf32>
    %cst_37 = arith.constant dense<0.000000e+00> : vector<8x128xf32>
    %47 = vector.multi_reduction <add>, %46, %cst_37 [1] : vector<8x8x128xf32> to vector<8x128xf32>
    %cst_38 = arith.constant 8.000000e+00 : f32
    %48 = vector.broadcast %cst_38 : f32 to vector<8x128xf32>
    %49 = arith.divf %47, %48 : vector<8x128xf32>
    %50 = arith.truncf %49 : vector<8x128xf32> to vector<8x128xbf16>
    %c0_39 = arith.constant 0 : index
    %c0_40 = arith.constant 0 : index
    %51 = vector.load %arg8[%c0_39, %c0_40] : memref<128x32xbf16, #tpu.memory_space<vmem>>, vector<128x32xbf16>
    %cst_41 = arith.constant dense<0.000000e+00> : vector<8x32xf32>
    %52 = tpu.matmul %50, %51, %cst_41 {dimension_numbers = #tpu.dot_dimension_numbers<[1], [0], [0], [1], [0, 0, 1, 1], [], []>} : vector<8x128xbf16>, vector<128x32xbf16>, vector<8x32xf32> -> vector<8x32xf32>
    %c0_42 = arith.constant 0 : index
    %c0_43 = arith.constant 0 : index
    %53 = vector.load %arg9[%c0_42, %c0_43] : memref<1x32xf32, #tpu.memory_space<vmem>>, vector<1x32xf32>
    %54 = vector.broadcast %53 : vector<1x32xf32> to vector<8x32xf32>
    %55 = arith.addf %52, %54 : vector<8x32xf32>
    %56 = arith.mulf %27, %55 : vector<8x32xf32>
    %cst_44 = arith.constant dense<0.000000e+00> : vector<8xf32>
    %57 = vector.multi_reduction <add>, %56, %cst_44 [1] : vector<8x32xf32> to vector<8xf32>
    %58 = vector.shape_cast %57 : vector<8xf32> to vector<8x1xf32>
    %59 = arith.mulf %27, %27 : vector<8x32xf32>
    %cst_45 = arith.constant dense<0.000000e+00> : vector<8xf32>
    %60 = vector.multi_reduction <add>, %59, %cst_45 [1] : vector<8x32xf32> to vector<8xf32>
    %61 = vector.shape_cast %60 : vector<8xf32> to vector<8x1xf32>
    %cst_46 = arith.constant 1.000000e-16 : f32
    %62 = vector.broadcast %cst_46 : f32 to vector<8x1xf32>
    %63 = arith.maximumf %61, %62 : vector<8x1xf32>
    %64 = arith.mulf %55, %55 : vector<8x32xf32>
    %cst_47 = arith.constant dense<0.000000e+00> : vector<8xf32>
    %65 = vector.multi_reduction <add>, %64, %cst_47 [1] : vector<8x32xf32> to vector<8xf32>
    %66 = vector.shape_cast %65 : vector<8xf32> to vector<8x1xf32>
    %cst_48 = arith.constant 1.000000e-16 : f32
    %67 = vector.broadcast %cst_48 : f32 to vector<8x1xf32>
    %68 = arith.maximumf %66, %67 : vector<8x1xf32>
    %69 = arith.mulf %63, %68 : vector<8x1xf32>
    %70 = math.rsqrt %69 : vector<8x1xf32>
    %71 = arith.mulf %58, %70 : vector<8x1xf32>
    %c0_49 = arith.constant 0 : index
    %c0_50 = arith.constant 0 : index
    %c0_51 = arith.constant 0 : index
    %72 = vector.load %arg3[%c0_49, %c0_50, %c0_51] : memref<1x8x1xf32, #tpu.memory_space<vmem>>, vector<1x8x1xf32>
    %73 = arith.negf %72 : vector<1x8x1xf32>
    %74 = math.exp %73 : vector<1x8x1xf32>
    %cst_52 = arith.constant 1.000000e+00 : f32
    %75 = vector.broadcast %cst_52 : f32 to vector<1x8x1xf32>
    %76 = arith.addf %75, %74 : vector<1x8x1xf32>
    %77 = arith.divf %75, %76 : vector<1x8x1xf32>
    %78 = vector.shape_cast %77 : vector<1x8x1xf32> to vector<8x1xf32>
    %c0_53 = arith.constant 0 : index
    %79 = memref.load %arg10[%c0_53] : memref<2xf32, #tpu.memory_space<smem>>
    %80 = vector.broadcast %79 : f32 to vector<8x1xf32>
    %81 = arith.mulf %71, %80 : vector<8x1xf32>
    %c1 = arith.constant 1 : index
    %82 = memref.load %arg10[%c1] : memref<2xf32, #tpu.memory_space<smem>>
    %83 = vector.broadcast %82 : f32 to vector<8x1xf32>
    %84 = arith.mulf %78, %83 : vector<8x1xf32>
    %85 = arith.addf %81, %84 : vector<8x1xf32>
    %c0_54 = arith.constant 0 : index
    %86 = memref.load %arg11[%c0_54] : memref<1xf32, #tpu.memory_space<smem>>
    %87 = vector.broadcast %86 : f32 to vector<8x1xf32>
    %88 = arith.addf %85, %87 : vector<8x1xf32>
    %89 = vector.shape_cast %88 : vector<8x1xf32> to vector<1x8x1xf32>
    %c0_55 = arith.constant 0 : index
    %c0_56 = arith.constant 0 : index
    %c0_57 = arith.constant 0 : index
    %90 = vector.load %arg12[%c0_55, %c0_56, %c0_57] : memref<1x8x1xf32, #tpu.memory_space<vmem>>, vector<1x8x1xf32>
    tpu.vector_store %arg12[%c0_55, %c0_56, %c0_57], %89 {strides = array<i32>} : memref<1x8x1xf32, #tpu.memory_space<vmem>>, vector<1x8x1xf32>,
    return
  }
  func.func @transform_0(%arg0: i32) -> (i32, i32, i32, i32) {
    %c0_i32 = arith.constant 0 : i32
    %c0_i32_0 = arith.constant 0 : i32
    %c0_i32_1 = arith.constant 0 : i32
    %c0_i32_2 = arith.constant 0 : i32
    return %arg0, %c0_i32, %c0_i32_0, %c0_i32_1 : i32, i32, i32, i32
  }
  func.func @transform_1(%arg0: i32) -> (i32, i32, i32, i32) {
    %c0_i32 = arith.constant 0 : i32
    %c0_i32_0 = arith.constant 0 : i32
    %c0_i32_1 = arith.constant 0 : i32
    %c0_i32_2 = arith.constant 0 : i32
    return %arg0, %c0_i32, %c0_i32_0, %c0_i32_1 : i32, i32, i32, i32
  }
  func.func @transform_2(%arg0: i32) -> (i32, i32, i32) {
    %c0_i32 = arith.constant 0 : i32
    %c0_i32_0 = arith.constant 0 : i32
    %c0_i32_1 = arith.constant 0 : i32
    return %arg0, %c0_i32, %c0_i32_0 : i32, i32, i32
  }
  func.func @transform_3(%arg0: i32) -> (i32, i32) {
    %c0_i32 = arith.constant 0 : i32
    %c0_i32_0 = arith.constant 0 : i32
    %c0_i32_1 = arith.constant 0 : i32
    return %c0_i32, %c0_i32_0 : i32, i32
  }
  func.func @transform_4(%arg0: i32) -> (i32, i32) {
    %c0_i32 = arith.constant 0 : i32
    %c0_i32_0 = arith.constant 0 : i32
    %c0_i32_1 = arith.constant 0 : i32
    return %c0_i32, %c0_i32_0 : i32, i32
  }
  func.func @transform_5(%arg0: i32) -> (i32, i32) {
    %c0_i32 = arith.constant 0 : i32
    %c0_i32_0 = arith.constant 0 : i32
    %c0_i32_1 = arith.constant 0 : i32
    return %c0_i32, %c0_i32_0 : i32, i32
  }
  func.func @transform_6(%arg0: i32) -> (i32, i32) {
    %c0_i32 = arith.constant 0 : i32
    %c0_i32_0 = arith.constant 0 : i32
    %c0_i32_1 = arith.constant 0 : i32
    return %c0_i32, %c0_i32_0 : i32, i32
  }
  func.func @transform_7(%arg0: i32) -> (i32, i32) {
    %c0_i32 = arith.constant 0 : i32
    %c0_i32_0 = arith.constant 0 : i32
    %c0_i32_1 = arith.constant 0 : i32
    return %c0_i32, %c0_i32_0 : i32, i32
  }
  func.func @transform_8(%arg0: i32) -> (i32, i32) {
    %c0_i32 = arith.constant 0 : i32
    %c0_i32_0 = arith.constant 0 : i32
    %c0_i32_1 = arith.constant 0 : i32
    return %c0_i32, %c0_i32_0 : i32, i32
  }
  func.func @transform_9(%arg0: i32) -> i32 {
    %c0_i32 = arith.constant 0 : i32
    %c0_i32_0 = arith.constant 0 : i32
    return %c0_i32 : i32
  }
  func.func @transform_10(%arg0: i32) -> i32 {
    %c0_i32 = arith.constant 0 : i32
    %c0_i32_0 = arith.constant 0 : i32
    return %c0_i32 : i32
  }
  func.func @transform_11(%arg0: i32) -> (i32, i32, i32) {
    %c0_i32 = arith.constant 0 : i32
    %c0_i32_0 = arith.constant 0 : i32
    %c0_i32_1 = arith.constant 0 : i32
    return %arg0, %c0_i32, %c0_i32_0 : i32, i32, i32
  }
}

module attributes {stable_mosaic.version = 11 : i64} {
  func.func @qa_sim_kernel(%arg0: i32, %arg1: memref<1x8x8x32xf32, #tpu.memory_space<vmem>>, %arg2: memref<1x8x8x32xf32, #tpu.memory_space<vmem>>, %arg3: memref<1x8x1xf32, #tpu.memory_space<vmem>>, %arg4: memref<32x128xbf16, #tpu.memory_space<vmem>>, %arg5: memref<1x128xf32, #tpu.memory_space<vmem>>, %arg6: memref<128x128xbf16, #tpu.memory_space<vmem>>, %arg7: memref<1x128xf32, #tpu.memory_space<vmem>>, %arg8: memref<128x32xbf16, #tpu.memory_space<vmem>>, %arg9: memref<1x32xf32, #tpu.memory_space<vmem>>, %arg10: memref<2xf32, #tpu.memory_space<smem>>, %arg11: memref<1xf32, #tpu.memory_space<smem>>, %arg12: memref<1x8x1xf32, #tpu.memory_space<vmem>>) attributes {dimension_semantics = [#tpu.dimension_semantics<parallel>], iteration_bounds = array<i64: 2>, scalar_prefetch = 0 : i64, scratch_operands = 0 : i64, tpu.core_type = #tpu.core_type<tc>, window_params = [{transform_indices = @transform_0, window_bounds = array<i64: 1, 8, 8, 32>}, {transform_indices = @transform_1, window_bounds = array<i64: 1, 8, 8, 32>}, {transform_indices = @transform_2, window_bounds = array<i64: 1, 8, 1>}, {pipeline_mode = #tpu.pipeline_mode<synchronous>, transform_indices = @transform_3, window_bounds = array<i64: 32, 128>}, {pipeline_mode = #tpu.pipeline_mode<synchronous>, transform_indices = @transform_4, window_bounds = array<i64: 1, 128>}, {pipeline_mode = #tpu.pipeline_mode<synchronous>, transform_indices = @transform_5, window_bounds = array<i64: 128, 128>}, {pipeline_mode = #tpu.pipeline_mode<synchronous>, transform_indices = @transform_6, window_bounds = array<i64: 1, 128>}, {pipeline_mode = #tpu.pipeline_mode<synchronous>, transform_indices = @transform_7, window_bounds = array<i64: 128, 32>}, {pipeline_mode = #tpu.pipeline_mode<synchronous>, transform_indices = @transform_8, window_bounds = array<i64: 1, 32>}, {transform_indices = @transform_9, window_bounds = array<i64: 2>}, {transform_indices = @transform_10, window_bounds = array<i64: 1>}, {transform_indices = @transform_11, window_bounds = array<i64: 1, 8, 1>}]} {
    %c0 = arith.constant 0 : index
    %c0_0 = arith.constant 0 : index
    %c0_1 = arith.constant 0 : index
    %c0_2 = arith.constant 0 : index
    %0 = vector.load %arg1[%c0, %c0_0, %c0_1, %c0_2] : memref<1x8x8x32xf32, #tpu.memory_space<vmem>>, vector<1x8x8x32xf32>
    %1 = arith.truncf %0 : vector<1x8x8x32xf32> to vector<1x8x8x32xbf16>
    %2 = vector.shape_cast %1 : vector<1x8x8x32xbf16> to vector<64x32xbf16>
    %c0_3 = arith.constant 0 : index
    %c0_4 = arith.constant 0 : index
    %3 = vector.load %arg4[%c0_3, %c0_4] : memref<32x128xbf16, #tpu.memory_space<vmem>>, vector<32x128xbf16>
    %cst = arith.constant dense<0.000000e+00> : vector<64x128xf32>
    %4 = tpu.matmul %2, %3, %cst {dimension_numbers = #tpu.dot_dimension_numbers<[1], [0], [0], [1], [0, 0, 1, 1], [], []>} : vector<64x32xbf16>, vector<32x128xbf16>, vector<64x128xf32> -> vector<64x128xf32>
    %c0_5 = arith.constant 0 : index
    %c0_6 = arith.constant 0 : index
    %5 = vector.load %arg5[%c0_5, %c0_6] : memref<1x128xf32, #tpu.memory_space<vmem>>, vector<1x128xf32>
    %6 = vector.broadcast %5 : vector<1x128xf32> to vector<64x128xf32>
    %7 = arith.addf %4, %6 : vector<64x128xf32>
    %cst_7 = arith.constant 0.000000e+00 : f32
    %8 = vector.broadcast %cst_7 : f32 to vector<64x128xf32>
    %9 = arith.maximumf %7, %8 : vector<64x128xf32>
    %10 = arith.truncf %9 : vector<64x128xf32> to vector<64x128xbf16>
    %c0_8 = arith.constant 0 : index
    %c0_9 = arith.constant 0 : index
    %11 = vector.load %arg6[%c0_8, %c0_9] : memref<128x128xbf16, #tpu.memory_space<vmem>>, vector<128x128xbf16>
    %cst_10 = arith.constant dense<0.000000e+00> : vector<64x128xf32>
    %12 = tpu.matmul %10, %11, %cst_10 {dimension_numbers = #tpu.dot_dimension_numbers<[1], [0], [0], [1], [0, 0, 1, 1], [], []>} : vector<64x128xbf16>, vector<128x128xbf16>, vector<64x128xf32> -> vector<64x128xf32>
    %c0_11 = arith.constant 0 : index
    %c0_12 = arith.constant 0 : index
    %13 = vector.load %arg7[%c0_11, %c0_12] : memref<1x128xf32, #tpu.memory_space<vmem>>, vector<1x128xf32>
    %14 = vector.broadcast %13 : vector<1x128xf32> to vector<64x128xf32>
    %15 = arith.addf %12, %14 : vector<64x128xf32>
    %cst_13 = arith.constant 0.000000e+00 : f32
    %16 = vector.broadcast %cst_13 : f32 to vector<64x128xf32>
    %17 = arith.maximumf %15, %16 : vector<64x128xf32>
    %18 = vector.shape_cast %17 : vector<64x128xf32> to vector<8x8x128xf32>
    %cst_14 = arith.constant dense<0.000000e+00> : vector<8x128xf32>
    %19 = vector.multi_reduction <add>, %18, %cst_14 [1] : vector<8x8x128xf32> to vector<8x128xf32>
    %cst_15 = arith.constant 8.000000e+00 : f32
    %20 = vector.broadcast %cst_15 : f32 to vector<8x128xf32>
    %21 = arith.divf %19, %20 : vector<8x128xf32>
    %22 = arith.truncf %21 : vector<8x128xf32> to vector<8x128xbf16>
    %c0_16 = arith.constant 0 : index
    %c0_17 = arith.constant 0 : index
    %23 = vector.load %arg8[%c0_16, %c0_17] : memref<128x32xbf16, #tpu.memory_space<vmem>>, vector<128x32xbf16>
    %cst_18 = arith.constant dense<0.000000e+00> : vector<8x32xf32>
    %24 = tpu.matmul %22, %23, %cst_18 {dimension_numbers = #tpu.dot_dimension_numbers<[1], [0], [0], [1], [0, 0, 1, 1], [], []>} : vector<8x128xbf16>, vector<128x32xbf16>, vector<8x32xf32> -> vector<8x32xf32>
    %c0_19 = arith.constant 0 : index
    %c0_20 = arith.constant 0 : index
    %25 = vector.load %arg9[%c0_19, %c0_20] : memref<1x32xf32, #tpu.memory_space<vmem>>, vector<1x32xf32>
    %26 = vector.broadcast %25 : vector<1x32xf32> to vector<8x32xf32>
    %27 = arith.addf %24, %26 : vector<8x32xf32>
    %c0_21 = arith.constant 0 : index
    %c0_22 = arith.constant 0 : index
    %c0_23 = arith.constant 0 : index
    %c0_24 = arith.constant 0 : index
    %28 = vector.load %arg2[%c0_21, %c0_22, %c0_23, %c0_24] : memref<1x8x8x32xf32, #tpu.memory_space<vmem>>, vector<1x8x8x32xf32>
    %29 = arith.truncf %28 : vector<1x8x8x32xf32> to vector<1x8x8x32xbf16>
    %30 = vector.shape_cast %29 : vector<1x8x8x32xbf16> to vector<64x32xbf16>
    %c0_25 = arith.constant 0 : index
    %c0_26 = arith.constant 0 : index
    %31 = vector.load %arg4[%c0_25, %c0_26] : memref<32x128xbf16, #tpu.memory_space<vmem>>, vector<32x128xbf16>
    %cst_27 = arith.constant dense<0.000000e+00> : vector<64x128xf32>
    %32 = tpu.matmul %30, %31, %cst_27 {dimension_numbers = #tpu.dot_dimension_numbers<[1], [0], [0], [1], [0, 0, 1, 1], [], []>} : vector<64x32xbf16>, vector<32x128xbf16>, vector<64x128xf32> -> vector<64x128xf32>
    %c0_28 = arith.constant 0 : index
    %c0_29 = arith.constant 0 : index
    %33 = vector.load %arg5[%c0_28, %c0_29] : memref<1x128xf32, #tpu.memory_space<vmem>>, vector<1x128xf32>
    %34 = vector.broadcast %33 : vector<1x128xf32> to vector<64x128xf32>
    %35 = arith.addf %32, %34 : vector<64x128xf32>
    %cst_30 = arith.constant 0.000000e+00 : f32
    %36 = vector.broadcast %cst_30 : f32 to vector<64x128xf32>
    %37 = arith.maximumf %35, %36 : vector<64x128xf32>
    %38 = arith.truncf %37 : vector<64x128xf32> to vector<64x128xbf16>
    %c0_31 = arith.constant 0 : index
    %c0_32 = arith.constant 0 : index
    %39 = vector.load %arg6[%c0_31, %c0_32] : memref<128x128xbf16, #tpu.memory_space<vmem>>, vector<128x128xbf16>
    %cst_33 = arith.constant dense<0.000000e+00> : vector<64x128xf32>
    %40 = tpu.matmul %38, %39, %cst_33 {dimension_numbers = #tpu.dot_dimension_numbers<[1], [0], [0], [1], [0, 0, 1, 1], [], []>} : vector<64x128xbf16>, vector<128x128xbf16>, vector<64x128xf32> -> vector<64x128xf32>
    %c0_34 = arith.constant 0 : index
    %c0_35 = arith.constant 0 : index
    %41 = vector.load %arg7[%c0_34, %c0_35] : memref<1x128xf32, #tpu.memory_space<vmem>>, vector<1x128xf32>
    %42 = vector.broadcast %41 : vector<1x128xf32> to vector<64x128xf32>
    %43 = arith.addf %40, %42 : vector<64x128xf32>
    %cst_36 = arith.constant 0.000000e+00 : f32
    %44 = vector.broadcast %cst_36 : f32 to vector<64x128xf32>
    %45 = arith.maximumf %43, %44 : vector<64x128xf32>
    %46 = vector.shape_cast %45 : vector<64x128xf32> to vector<8x8x128xf32>
    %cst_37 = arith.constant dense<0.000000e+00> : vector<8x128xf32>
    %47 = vector.multi_reduction <add>, %46, %cst_37 [1] : vector<8x8x128xf32> to vector<8x128xf32>
    %cst_38 = arith.constant 8.000000e+00 : f32
    %48 = vector.broadcast %cst_38 : f32 to vector<8x128xf32>
    %49 = arith.divf %47, %48 : vector<8x128xf32>
    %50 = arith.truncf %49 : vector<8x128xf32> to vector<8x128xbf16>
    %c0_39 = arith.constant 0 : index
    %c0_40 = arith.constant 0 : index
    %51 = vector.load %arg8[%c0_39, %c0_40] : memref<128x32xbf16, #tpu.memory_space<vmem>>, vector<128x32xbf16>
    %cst_41 = arith.constant dense<0.000000e+00> : vector<8x32xf32>
    %52 = tpu.matmul %50, %51, %cst_41 {dimension_numbers = #tpu.dot_dimension_numbers<[1], [0], [0], [1], [0, 0, 1, 1], [], []>} : vector<8x128xbf16>, vector<128x32xbf16>, vector<8x32xf32> -> vector<8x32xf32>
    %c0_42 = arith.constant 0 : index
    %c0_43 = arith.constant 0 : index
    %53 = vector.load %arg9[%c0_42, %c0_43] : memref<1x32xf32, #tpu.memory_space<vmem>>, vector<1x32xf32>
    %54 = vector.broadcast %53 : vector<1x32xf32> to vector<8x32xf32>
    %55 = arith.addf %52, %54 : vector<8x32xf32>
    %56 = arith.mulf %27, %55 : vector<8x32xf32>
    %cst_44 = arith.constant dense<0.000000e+00> : vector<8xf32>
    %57 = vector.multi_reduction <add>, %56, %cst_44 [1] : vector<8x32xf32> to vector<8xf32>
    %58 = vector.shape_cast %57 : vector<8xf32> to vector<8x1xf32>
    %59 = arith.mulf %27, %27 : vector<8x32xf32>
    %cst_45 = arith.constant dense<0.000000e+00> : vector<8xf32>
    %60 = vector.multi_reduction <add>, %59, %cst_45 [1] : vector<8x32xf32> to vector<8xf32>
    %61 = vector.shape_cast %60 : vector<8xf32> to vector<8x1xf32>
    %cst_46 = arith.constant 1.000000e-16 : f32
    %62 = vector.broadcast %cst_46 : f32 to vector<8x1xf32>
    %63 = arith.maximumf %61, %62 : vector<8x1xf32>
    %64 = arith.mulf %55, %55 : vector<8x32xf32>
    %cst_47 = arith.constant dense<0.000000e+00> : vector<8xf32>
    %65 = vector.multi_reduction <add>, %64, %cst_47 [1] : vector<8x32xf32> to vector<8xf32>
    %66 = vector.shape_cast %65 : vector<8xf32> to vector<8x1xf32>
    %cst_48 = arith.constant 1.000000e-16 : f32
    %67 = vector.broadcast %cst_48 : f32 to vector<8x1xf32>
    %68 = arith.maximumf %66, %67 : vector<8x1xf32>
    %69 = arith.mulf %63, %68 : vector<8x1xf32>
    %70 = math.rsqrt %69 : vector<8x1xf32>
    %71 = arith.mulf %58, %70 : vector<8x1xf32>
    %c0_49 = arith.constant 0 : index
    %c0_50 = arith.constant 0 : index
    %c0_51 = arith.constant 0 : index
    %72 = vector.load %arg3[%c0_49, %c0_50, %c0_51] : memref<1x8x1xf32, #tpu.memory_space<vmem>>, vector<1x8x1xf32>
    %73 = arith.negf %72 : vector<1x8x1xf32>
    %74 = math.exp %73 : vector<1x8x1xf32>
    %cst_52 = arith.constant 1.000000e+00 : f32
    %75 = vector.broadcast %cst_52 : f32 to vector<1x8x1xf32>
    %76 = arith.addf %75, %74 : vector<1x8x1xf32>
    %77 = arith.divf %75, %76 : vector<1x8x1xf32>
    %78 = vector.shape_cast %77 : vector<1x8x1xf32> to vector<8x1xf32>
    %c0_53 = arith.constant 0 : index
    %79 = memref.load %arg10[%c0_53] : memref<2xf32, #tpu.memory_space<smem>>
    %80 = vector.broadcast %79 : f32 to vector<8x1xf32>
    %81 = arith.mulf %71, %80 : vector<8x1xf32>
    %c1 = arith.constant 1 : index
    %82 = memref.load %arg10[%c1] : memref<2xf32, #tpu.memory_space<smem>>
    %83 = vector.broadcast %82 : f32 to vector<8x1xf32>
    %84 = arith.mulf %78, %83 : vector<8x1xf32>
    %85 = arith.addf %81, %84 : vector<8x1xf32>
    %c0_54 = arith.constant 0 : index
    %86 = memref.load %arg11[%c0_54] : memref<1xf32, #tpu.memory_space<smem>>
    %87 = vector.broadcast %86 : f32 to vector<8x1xf32>
    %88 = arith.addf %85, %87 : vector<8x1xf32>
    %89 = vector.shape_cast %88 : vector<8x1xf32> to vector<1x8x1xf32>
    %c0_55 = arith.constant 0 : index
    %c0_56 = arith.constant 0 : index
    %c0_57 = arith.constant 0 : index
    %90 = vector.load %arg12[%c0_55, %c0_56, %c0_57] : memref<1x8x1xf32, #tpu.memory_space<vmem>>, vector<1x8x1xf32>
    tpu.vector_store %arg12[%c0_55, %c0_56, %c0_57], %89 {strides = array<i32>} : memref<1x8x1xf32, #tpu.memory_space<vmem>>, vector<1x8x1xf32>,
    return
  }
  func.func @transform_0(%arg0: i32) -> (i32, i32, i32, i32) {
    %c0_i32 = arith.constant 0 : i32
    %c0_i32_0 = arith.constant 0 : i32
    %c0_i32_1 = arith.constant 0 : i32
    %c0_i32_2 = arith.constant 0 : i32
    return %arg0, %c0_i32, %c0_i32_0, %c0_i32_1 : i32, i32, i32, i32
  }
  func.func @transform_1(%arg0: i32) -> (i32, i32, i32, i32) {
    %c0_i32 = arith.constant 0 : i32
    %c0_i32_0 = arith.constant 0 : i32
    %c0_i32_1 = arith.constant 0 : i32
    %c0_i32_2 = arith.constant 0 : i32
    return %arg0, %c0_i32, %c0_i32_0, %c0_i32_1 : i32, i32, i32, i32
  }
  func.func @transform_2(%arg0: i32) -> (i32, i32, i32) {
    %c0_i32 = arith.constant 0 : i32
    %c0_i32_0 = arith.constant 0 : i32
    %c0_i32_1 = arith.constant 0 : i32
    return %arg0, %c0_i32, %c0_i32_0 : i32, i32, i32
  }
  func.func @transform_3(%arg0: i32) -> (i32, i32) {
    %c0_i32 = arith.constant 0 : i32
    %c0_i32_0 = arith.constant 0 : i32
    %c0_i32_1 = arith.constant 0 : i32
    return %c0_i32, %c0_i32_0 : i32, i32
  }
  func.func @transform_4(%arg0: i32) -> (i32, i32) {
    %c0_i32 = arith.constant 0 : i32
    %c0_i32_0 = arith.constant 0 : i32
    %c0_i32_1 = arith.constant 0 : i32
    return %c0_i32, %c0_i32_0 : i32, i32
  }
  func.func @transform_5(%arg0: i32) -> (i32, i32) {
    %c0_i32 = arith.constant 0 : i32
    %c0_i32_0 = arith.constant 0 : i32
    %c0_i32_1 = arith.constant 0 : i32
    return %c0_i32, %c0_i32_0 : i32, i32
  }
  func.func @transform_6(%arg0: i32) -> (i32, i32) {
    %c0_i32 = arith.constant 0 : i32
    %c0_i32_0 = arith.constant 0 : i32
    %c0_i32_1 = arith.constant 0 : i32
    return %c0_i32, %c0_i32_0 : i32, i32
  }
  func.func @transform_7(%arg0: i32) -> (i32, i32) {
    %c0_i32 = arith.constant 0 : i32
    %c0_i32_0 = arith.constant 0 : i32
    %c0_i32_1 = arith.constant 0 : i32
    return %c0_i32, %c0_i32_0 : i32, i32
  }
  func.func @transform_8(%arg0: i32) -> (i32, i32) {
    %c0_i32 = arith.constant 0 : i32
    %c0_i32_0 = arith.constant 0 : i32
    %c0_i32_1 = arith.constant 0 : i32
    return %c0_i32, %c0_i32_0 : i32, i32
  }
  func.func @transform_9(%arg0: i32) -> i32 {
    %c0_i32 = arith.constant 0 : i32
    %c0_i32_0 = arith.constant 0 : i32
    return %c0_i32 : i32
  }
  func.func @transform_10(%arg0: i32) -> i32 {
    %c0_i32 = arith.constant 0 : i32
    %c0_i32_0 = arith.constant 0 : i32
    return %c0_i32 : i32
  }
  func.func @transform_11(%arg0: i32) -> (i32, i32, i32) {
    %c0_i32 = arith.constant 0 : i32
    %c0_i32_0 = arith.constant 0 : i32
    %c0_i32_1 = arith.constant 0 : i32
    return %arg0, %c0_i32, %c0_i32_0 : i32, i32, i32
  }
}

</mosaic_0001>

<bundles_post_ra>
// kernel: tpu_custom_call.1
= control target key start
LH: loop header
LB: loop body
LE: loop exit
PB: predicated region body
PF: predicated region fallthrough
CT: control target
= control target key end

     0   :  { %s2375_s0 = inlined_call_operand.hbm [shape: f32[2,8,8,32], index: 0, kind: input, shape index: {}]   ;;  %s2376_s1 = inlined_call_operand.hbm [shape: f32[2,8,8,32], index: 1, kind: input, shape index: {}]   ;;  %s2377_s2 = inlined_call_operand.vmem [shape: f32[2,8,1], index: 2, kind: input, shape index: {}]   ;;  %s2378_s3 = inlined_call_operand.vmem [shape: bf16[32,128], index: 3, kind: input, shape index: {}]   ;;  %s2379_s4 = inlined_call_operand.vmem [shape: f32[1,128], index: 4, kind: input, shape index: {}]   ;;  %s2380_s5 = inlined_call_operand.vmem [shape: bf16[128,128], index: 5, kind: input, shape index: {}]   ;;  %s2381_s6 = inlined_call_operand.vmem [shape: f32[1,128], index: 6, kind: input, shape index: {}]   ;;  %s2382_s7 = inlined_call_operand.vmem [shape: bf16[128,32], index: 7, kind: input, shape index: {}]   ;;  %s2383_s8 = inlined_call_operand.vmem [shape: f32[1,32], index: 8, kind: input, shape index: {}]   ;;  %s2384_s9 = inlined_call_operand.vmem [shape: f32[2], index: 9, kind: input, shape index: {}]   ;;  %s2385_s10 = inlined_call_operand.<no memory space> [shape: f32[1], index: 10, kind: input, shape index: {}]   ;;  %s2386_s11 = inlined_call_operand.vmem [shape: f32[2,8,1], index: 11, kind: output, shape index: {}]  }
   0x1   :  { %2391 = sst [smem:[#allocation14_spill]] %s2375_s0 }
   0x2   :  { %2392 = sst [smem:[#allocation15_spill]] %s2384_s9 }
   0x3   :  { %16 = sst [smem:[#allocation2]] %s2385_s10 }
   0x4   :  { %17 = vsyncpa [#allocation4], 0 }
   0x5   :  { %19 = vsyncpa [#allocation4 + $0x1], 0 }
   0x6   :  { %20 = vsyncpa [#allocation7], 0 }
   0x7   :  { %22 = vsyncpa [#allocation7 + $0x1], 0 }
   0x8   :  { %23 = vsyncpa [#allocation5], 0  ;;  %s1959_s19 = smov 0   ;;  %s1961_s20 = smov 0  }
   0x9   :  { %s1963_s21 = smov 0   ;;  %s1965_s22 = smov 0  }
   0xa LB: > { %2393 = sst [smem:[#allocation12_spill]] %s1883_s21  ;;  %s1978_s10 = sadd.s32 4294967295, %s1887_s22   ;;  %s1887_s22 = sphi %s1965_s22, %s2408_s22   ;;  %s1883_s21 = sphi %s1963_s21, %s2405_s21   ;;  %s1879_s20 = sphi %s1961_s20, %s2407_s20   ;;  %s1875_s19 = sphi %s1959_s19, %s2406_s19  }
   0xb   : > { %s1981_s23 = sadd.s32 1, %s1887_s22   ;;  %s36_s25 = sadd.s32 1, %s1883_s21 }
   0xc   : > { %s33_s24 = ssub.s32 %s1887_s22, %s1981_s23  ;;  %p43_p1 = scmp.ne.s32.totalorder %s1883_s21, %s1879_s20 }
   0xd   : > { %p34_p0 = scmp.eq.s32.totalorder %s33_s24, 0  ;;  %p44_p2 = scmp.eq.s32.totalorder %s1887_s22, 0 }
   0xe   : > { %p49_p3 = scmp.ne.s32.totalorder %s1879_s20, %s1875_s19  ;;  %p50_p5 = scmp.eq.s32.totalorder %s1978_s10, 0 }
   0xf   : > { %s1991_s26 = scalar_select %p34_p0, %s1883_s21, %s36_s25  }
  0x10   : > { %p45_p4 = por %p44_p2, %p43_p1  ;;  %p1455_p6 = scmp.ge.s32.totalorder %s1887_s22, 1 }
  0x11   : > { %2394 = sst [smem:[#allocation13_spill]] %s1991_s26  ;;  %p306_p7 = scmp.lt.s32.totalorder %s1887_s22, 3 }
  0x12   : > { %p1998_p8 = por %p50_p5, %p49_p3  ;;  %s2397_s9 = sld [smem:[#allocation15_spill]] }
  0x13   : > { %p2002_p9 = pnand %p1455_p6, %p306_p7  ;;  %p1707_p11 = scmp.lt.s32.totalorder %s1887_s22, 2 }
  0x14   : > { %s2395_s27 = scalar_select %p1998_p8, 1, 0 }
  0x15   : > { %s2396_s28 = scalar_select %p2002_p9, 1, 0 }
  0x16   : > { %p1695_p10 = pneg %p2002_p9  ;;  %s2013_s13 = sand.u32 1, %s1883_s21  }
  0x17   : > { %p2021_p13 = pnand %p1707_p11, %p45_p4  ;;  %s1458_s16 = sshll.u32 %s2013_s13, 6 }
  0x18   : > { %s337_s12 = sshll.u32 %s2397_s9, 4  ;;  %p2017_p12 = pnand %p1695_p10, %p50_p5  ;;  %s338_s12 = int_to_ptr.vmem [resolvable:$true] %s337_s12 }
  0x19   : > { %s1770_s17 = scalar_lea.vmem %s338_s12, 16  ;;  %p1778_p6 = scmp.lt.s32.totalorder %s338_s12, %s338_s12 }
  0x1a   : > { %p1771_p0 = scmp.ne.s32.totalorder %s338_s12, %s1770_s17  ;;  %p1772_p1 = pneg %p2017_p12 }
  0x1b   : > { %p1779_p7 = scmp.lt.s32.totalorder %s1770_s17, %s1770_s17 }
  0x1c   : > { %p1773_p2 = pnand %p1772_p1, %p1771_p0 }
  0x1d   : > { %p1780_p8 = por %p1779_p7, %p1778_p6 }
  0x1e   : > { %p1774_p3 = pneg %p1773_p2 }
  0x20   : > { %p1781_p9 = pnand %p1780_p8, %p1774_p3 }
  0x22   : > { %1784 = shalt.err (!%p1781_p9)
}
  0x23   : > { %s1889_s18 = smov [#allocation8]   ;;  %s2389_s19 = sshll.u32 %s1887_s22, 10 }
  0x24   : > { %1698 = dma.vmem_to_smem (!%p2017_p12), %s338_s12, 16, %s1889_s18, [#allocation5]  }
  0x25   : > { %s2400_s0 = sld [smem:[#allocation14_spill]]  ;;  %s355_s30 = scalar_lea.vmem [#allocation3], %s1458_s16 }
  0x26   : > { %s362_s14 = sshll.u32 %s355_s30, 4  ;;  %s352_s17 = scalar_lea.sflag [#allocation4], %s2013_s13  ;;  %s2040_s14 = int_to_ptr.vmem [resolvable:$true] %s362_s14 }
  0x27   : > { %p1787_p8 = pneg %p2021_p13 }
  0x2b   : > { %s2036_s29 = scalar_lea.hbm %s2400_s0, %s2389_s19  ;;  %s1790_s24 = scalar_lea.hbm %s2400_s0, 2048 }
  0x2c   : > { %s1785_s9 = scalar_lea.hbm %s2036_s29, 1024  ;;  %p1791_p11 = scmp.lt.u32.totalorder %s2036_s29, %s2400_s0 }
  0x2d   : > { %p1786_p4 = scmp.ne.s32.totalorder %s2036_s29, %s1785_s9  ;;  %p1792_p12 = scmp.lt.u32.totalorder %s1790_s24, %s1785_s9 }
  0x2e   : > { %p1794_p1 = scmp.lt.u32.totalorder %s1785_s9, %s2036_s29 }
  0x2f   : > { %p1788_p9 = pnand %p1787_p8, %p1786_p4  ;;  %p1793_p0 = por %p1792_p12, %p1791_p11 }
  0x31   : > { %p1789_p10 = pneg %p1788_p9  ;;  %p1795_p2 = por %p1794_p1, %p1793_p0 }
  0x33   : > { %p1796_p3 = pnand %p1795_p2, %p1789_p10 }
  0x35   : > { %1799 = shalt.err (!%p1796_p3)
}
  0x36   : > { %s1800_s30 = scalar_lea.vmem %s2040_s14, 1024  ;;  %s1890_s12 = smov [#allocation3]  }
  0x37   : > { %p1801_p6 = scmp.ne.s32.totalorder %s2040_s14, %s1800_s30  ;;  %s1805_s18 = sshll.u32 %s1890_s12, 4  ;;  %s1806_s18 = int_to_ptr.vmem [resolvable:$false] %s1805_s18 }
  0x38   : > { %s1807_s19 = scalar_lea.vmem %s1806_s18, 2048  ;;  %p1808_p9 = scmp.lt.s32.totalorder %s2040_s14, %s1806_s18 }
  0x39   : > { %p1803_p7 = pnand %p1801_p6, %p1787_p8  ;;  %p1809_p11 = scmp.lt.s32.totalorder %s1807_s19, %s1800_s30 }
  0x3b   : > { %p1804_p4 = pneg %p1803_p7  ;;  %p1810_p12 = por %p1809_p11, %p1808_p9 }
  0x3d   : > { %p1811_p0 = pnand %p1810_p12, %p1804_p4 }
  0x3f   : > { %1814 = shalt.err (!%p1811_p0)
}
  0x40   : > { %s1891_s9 = smov 128   ;;  %s1892_s24 = smov 8  }
  0x41   : > { %1702 = dma.hbm_to_vmem [thread:$0]  (!%p2021_p13), %s2036_s29, 1024, %s2040_s14, %s352_s17, %s1891_s9, %s1891_s9, %s1892_s24  }
  0x42   : > { %s2401_s25 = sshll.u32 %s1887_s22, 10  ;;  %s376_s19 = scalar_lea.vmem [#allocation6], %s1458_s16 }
  0x43   : > { %s2078_s18 = scalar_lea.hbm %s2376_s1, %s2401_s25  ;;  %s383_s0 = sshll.u32 %s376_s19, 4  ;;  %s2082_s0 = int_to_ptr.vmem [resolvable:$true] %s383_s0 }
  0x44   : > { %s373_s26 = scalar_lea.sflag [#allocation7], %s2013_s13  ;;  %s1815_s21 = scalar_lea.hbm %s2078_s18, 1024 }
  0x45   : > { %p1816_p10 = scmp.ne.s32.totalorder %s2078_s18, %s1815_s21  ;;  %s1820_s14 = scalar_lea.hbm %s2376_s1, 2048 }
  0x46   : > { %p1821_p3 = scmp.lt.u32.totalorder %s2078_s18, %s2376_s1  ;;  %p1822_p6 = scmp.lt.u32.totalorder %s1820_s14, %s1815_s21 }
  0x47   : > { %p1818_p1 = pnand %p1816_p10, %p1787_p8  ;;  %p1824_p4 = scmp.lt.u32.totalorder %s1815_s21, %s2078_s18 }
  0x48   : > { %p1823_p7 = por %p1822_p6, %p1821_p3 }
  0x49   : > { %p1819_p2 = pneg %p1818_p1 }
  0x4a   : > { %p1825_p9 = por %p1824_p4, %p1823_p7 }
  0x4c   : > { %p1826_p11 = pnand %p1825_p9, %p1819_p2 }
  0x4e   : > { %1829 = shalt.err (!%p1826_p11)
}
  0x4f   : > { %s1830_s16 = scalar_lea.vmem %s2082_s0, 1024  ;;  %s1893_s30 = smov [#allocation6]  }
  0x50   : > { %p1831_p12 = scmp.ne.s32.totalorder %s2082_s0, %s1830_s16  ;;  %s1835_s12 = sshll.u32 %s1893_s30, 4  ;;  %s1836_s12 = int_to_ptr.vmem [resolvable:$false] %s1835_s12 }
  0x51   : > { %s1837_s19 = scalar_lea.vmem %s1836_s12, 2048  ;;  %p1838_p1 = scmp.lt.s32.totalorder %s2082_s0, %s1836_s12 }
  0x52   : > { %p1833_p0 = pnand %p1831_p12, %p1787_p8  ;;  %p1839_p3 = scmp.lt.s32.totalorder %s1837_s19, %s1830_s16 }
  0x54   : > { %p1834_p10 = pneg %p1833_p0  ;;  %p1840_p6 = por %p1839_p3, %p1838_p1 }
  0x56   : > { %p1841_p7 = pnand %p1840_p6, %p1834_p10 }
  0x58   : > { %1844 = shalt.err (!%p1841_p7)
}
  0x59   : > { %1705 = dma.hbm_to_vmem [thread:$0]  (!%p2021_p13), %s2078_s18, 1024, %s2082_s0, %s373_s26, %s1891_s9, %s1891_s9, %s1892_s24  }
  0x5a   : > { %p2402_p8 = scmp.ne.s32.totalorder %s2396_s28, 0 }
  0x5b   : > { %s404_s21 = sand.u32 (!%p2402_p8), 1, %s1879_s20   ;;  %p2403_p2 = scmp.ne.s32.totalorder (!%p2402_p8), %s2395_s27, 0 }
  0x5c   : > { %402 = sbr.rel (%p2402_p8) target bundleno = 1450 (0x5aa), region = 64  ;;  %s1465_s22 = sshll.u32 (!%p2402_p8), %s404_s21, 6 }
  0x5d   : > { %s405_s29 = scalar_lea.sflag (!%p2402_p8), [#allocation4], %s404_s21  ;;  %s2116_s14 = scalar_lea.vmem (!%p2402_p8), [#allocation3], %s1465_s22 }
  0x63   : > { %1862 = dma.done.wait (%p2403_p2), %s405_s29, 1024  }
  0x64   : > { %1864 = vsyncadd (%p2403_p2), %s405_s29, 4294966272  ;;  %s414_s13 = scalar_lea.sflag [#allocation7], %s404_s21  ;;  %s2122_s15 = scalar_lea.vmem [#allocation6], %s1465_s22 }
  0x65   : > { %1866 = dma.done.wait (%p2403_p2), %s414_s13, 1024  }
  0x66   : > { %1868 = vsyncadd (%p2403_p2), %s414_s13, 4294966272 }
  0x67   : > { %1870 = dma.done.wait (%p50_p5), [#allocation5], 16  }
  0x68   : > { %1872 = vsyncadd (%p50_p5), [#allocation5], 4294967280 }
  0x69   : > { %426 = sfence }
  0x6a   : > { %v2135_v0 = vld [vmem:[%s2378_s3] sm:$0xff]   ;;  %v2140_v1 = vld [vmem:[%s2378_s3 + $0x8] sm:$0xff]   ;;  %vm537_vm0 = vcmask 261120   ;;  %v480_v5 = vld [vmem:[%s2116_s14 + $0x10] sm:$0xff]  ;;  %v1894_v52 = vmov 0.0   ;;  %vm1895_vm1 = vmmov 0  }
  0x6b   : > { %1575 = vmatprep.subr.bf16.mxu0 %v2135_v0  ;;  %v478_v2 = vld [vmem:[%s2116_s14] sm:$0xff]  ;;  %v479_v3 = vld [vmem:[%s2116_s14 + $0x8] sm:$0xff]  ;;  %v481_v6 = vld [vmem:[%s2116_s14 + $0x18] sm:$0xff]  ;;  %vm875_vm2 = vcmask 1041409   ;;  %vm877_vm3 = vcmask 1042434   ;;  %vm879_vm4 = vcmask 1043459  }
  0x6c   : > { %1576 = vmatpush3.bf16.msra.mxu0 %v2135_v0  ;;  %v1513_v4 = vpack.c.bf16 %v479_v3, %v478_v2  ;;  %v482_v7 = vld [vmem:[%s2116_s14 + $0x20] sm:$0xff]  ;;  %v483_v8 = vld [vmem:[%s2116_s14 + $0x28] sm:$0xff]  ;;  %v1514_v10 = vpack.c.bf16 %v481_v6, %v480_v5  ;;  %v484_v13 = vld [vmem:[%s2116_s14 + $0x30] sm:$0xff]  ;;  %vm881_vm5 = vcmask 1044484   ;;  %vm883_vm6 = vcmask 1045509   ;;  %p469_p5 = scmp.lt.s32.totalorder %s1978_s10, 1 }
  0x6d   : > { %1577 = vmatprep.subr.bf16.mxu0 %v2140_v1  ;;  %v1748_v9 = vld [vmem:[%s2380_s5] sm:$0xff]   ;;  %v2158_v11 = vld [vmem:[%s2380_s5 + $0x8] sm:$0xff]   ;;  %v1515_v12 = vpack.c.bf16 %v483_v8, %v482_v7  ;;  %v1750_v14 = vld [vmem:[%s2380_s5 + $0x10] sm:$0xff]   ;;  %vm885_vm7 = vcmask 1046534   ;;  %vm887_vm8 = vcmask 1047559   ;;  %s1508_s16 = sld [smem:[#allocation8 + $0x1]] }
  0x6e   : > { %1579 = vmatprep.mubr.msk.bf16.mxu0 %vm537_vm0, %v1513_v4  ;;  %1587 = vmatprep.subr.bf16.mxu1 %v1748_v9  ;;  %v485_v15 = vld [vmem:[%s2116_s14 + $0x38] sm:$0xff]  ;;  %v1752_v18 = vld [vmem:[%s2380_s5 + $0x20] sm:$0xff]   ;;  %v1753_v19 = vld [vmem:[%s2380_s5 + $0x28] sm:$0xff]   ;;  %s2410_s10 = smov (!%p469_p5, %s1978_s10), 1  ;;  %s1330_s30 = sld [smem:[#allocation8]]  ;;  %vm1340_vm9 = vcmask 7168  }
  0x6f   : > { %1588 = vmatpush3.bf16.msra.mxu1 %v1748_v9  ;;  %v1751_v16 = vld [vmem:[%s2380_s5 + $0x18] sm:$0xff]   ;;  %v1516_v17 = vpack.c.bf16 %v485_v15, %v484_v13  ;;  %v1754_v20 = vld [vmem:[%s2380_s5 + $0x30] sm:$0xff]   ;;  %v2189_v22 = vld [vmem:[%s2379_s4] ss:$0 sm:$0xff]  ;;  %s1468_s24 = sshll.u32 %s2410_s10, 3  ;;  %s1337_s12 = sld [smem:[#allocation2]] }
  0x70   : > { %1578 = vmatpush3.bf16.msra.mxu0 %v2140_v1  ;;  %1589 = vmatprep.subr.bf16.mxu1 %v2158_v11  ;;  %v1755_v21 = vld [vmem:[%s2380_s5 + $0x38] sm:$0xff]   ;;  %v2204_v51 = vld [vmem:[%s2382_s7] sm:$0xff]   ;;  %v2212_v53 = vld [vmem:[%s2382_s7 + $0x8] sm:$0xff]   ;;  %s472_s25 = scalar_lea.vmem %s2377_s2, %s1468_s24  ;;  %s476_s21 = scalar_lea.vmem %s2386_s11, %s1468_s24 }
  0x71   : > { %1611 = vmatprep.subr.bf16.mxu0 %v1894_v52  ;;  %v2219_v54 = vld [vmem:[%s2382_s7 + $0x10] sm:$0xff]   ;;  %v2226_v55 = vld [vmem:[%s2382_s7 + $0x18] sm:$0xff]   ;;  %v2233_v56 = vld [vmem:[%s2382_s7 + $0x20] sm:$0xff]  }
  0x72   : > { %v2240_v57 = vld [vmem:[%s2382_s7 + $0x28] sm:$0xff]   ;;  %v2247_v58 = vld [vmem:[%s2382_s7 + $0x30] sm:$0xff]   ;;  %v2254_v59 = vld [vmem:[%s2382_s7 + $0x38] sm:$0xff]  }
  0x73   : > { %1580 = vmatmul.mubr.msk.bf16.vlgmr.msra.gmra.mrb[0].mxu0 %vm537_vm0, %v1514_v10  ;;  %1590 = vmatpush3.bf16.msra.mxu1 %v2158_v11  ;;  %v2263_v60 = vld [vmem:[%s2381_s6] ss:$0 sm:$0xff] }
  0x74   : > { %1583 = vmatprep.mubr.msk.bf16.mxu0 %vm537_vm0, %v1515_v12  ;;  %1591 = vmatprep.subr.bf16.mxu1 %v1750_v14 }
  0x75   : > { %1612 = vmatpush3.bf16.msra.mxu0 %v2204_v51 }
  0x76   : > { %1613 = vmatprep.subr.bf16.mxu0 %v1894_v52 }
  0x77   : > { %1592 = vmatpush3.bf16.msra.mxu1 %v1750_v14 }
  0x78   : > { %1593 = vmatprep.subr.bf16.mxu1 %v1751_v16 }
  0x79   : > { %1614 = vmatpush3.bf16.msra.mxu0 %v2212_v53 }
  0x7a   : > { %1615 = vmatprep.subr.bf16.mxu0 %v1894_v52 }
  0x7b   : > { %1584 = vmatmul.mubr.msk.bf16.gmra.mrb[4].mxu0 %vm537_vm0, %v1516_v17  ;;  %1594 = vmatpush3.bf16.msra.mxu1 %v1751_v16 }
  0x7c   : > { %1595 = vmatprep.subr.bf16.mxu1 %v1752_v18  ;;  %1627 = vmatprep.mubr.msk.bf16.mxu0 %vm1895_vm1, %v1894_v52 }
  0x7d   : > { %1616 = vmatpush3.bf16.msra.mxu0 %v2219_v54 }
  0x7e   : > { %1617 = vmatprep.subr.bf16.mxu0 %v1894_v52 }
  0x7f   : > { %1596 = vmatpush3.bf16.msra.mxu1 %v1752_v18 }
  0x80   : > { %1597 = vmatprep.subr.bf16.mxu1 %v1753_v19 }
  0x81   : > { %1618 = vmatpush3.bf16.msra.mxu0 %v2226_v55 }
  0x82   : > { %1619 = vmatprep.subr.bf16.mxu0 %v1894_v52 }
  0x83   : > { %1598 = vmatpush3.bf16.msra.mxu1 %v1753_v19 }
  0x84   : > { %1599 = vmatprep.subr.bf16.mxu1 %v1754_v20 }
  0x85   : > { %1620 = vmatpush3.bf16.msra.mxu0 %v2233_v56 }
  0x86   : > { %1621 = vmatprep.subr.bf16.mxu0 %v1894_v52 }
  0x87   : > { %1600 = vmatpush3.bf16.msra.mxu1 %v1754_v20 }
  0x88   : > { %1601 = vmatprep.subr.bf16.mxu1 %v1755_v21 }
  0x89   : > { %1622 = vmatpush3.bf16.msra.mxu0 %v2240_v57 }
  0x8a   : > { %1623 = vmatprep.subr.bf16.mxu0 %v1894_v52 }
  0x8b   : > { %1602 = vmatpush3.bf16.msra.mxu1 %v1755_v21 }
  0x8c   : > { %1643 = vmatprep.subr.bf16.mxu1 %v1748_v9 }
  0x8d   : > { %1624 = vmatpush3.bf16.msra.mxu0 %v2247_v58 }
  0x8e   : > { %1625 = vmatprep.subr.bf16.mxu0 %v1894_v52 }
  0x91   : > { %1626 = vmatpush3.bf16.msra.mxu0 %v2254_v59 }
  0x92   : > { %1631 = vmatprep.subr.bf16.mxu0 %v2135_v0 }
 0x146   : > { %v1581_v23 = vpop.f32.mrb[0].mxu0 }
 0x147   : > { %v593_v24 = vadd.f32 %v1581_v23, %v2189_v22  ;;  %v584_v25 = vpop.f32.mrb[1].mxu0 }
 0x148   : > { %v585_v26 = vadd.f32 %v2189_v22, %v584_v25  ;;  %v1582_v27 = vpop.f32.mrb[2].mxu0 }
 0x149   : > { %v596_v28 = vadd.f32 %v1582_v27, %v2189_v22  ;;  %v587_v29 = vpop.f32.mrb[3].mxu0  ;;  %v617_v31 = vmax.f32 %v593_v24, 0.0 }
 0x14a   : > { %v588_v30 = vadd.f32 %v2189_v22, %v587_v29  ;;  %v615_v33 = vmax.f32 %v585_v26, 0.0 }
 0x14b   : > { %v618_v32 = vmax.f32 %v596_v28, 0.0 }
 0x14c   : > { %v616_v34 = vmax.f32 %v588_v30, 0.0 }
 0x14d   : > { %v624_v35 = vpack.c.bf16 %v618_v32, %v617_v31 }
 0x14e   : > { %v1585_v36 = vpop.f32.mrb[4].mxu0  ;;  %v623_v37 = vpack.c.bf16 %v616_v34, %v615_v33 }
 0x14f   : > { %v609_v38 = vadd.f32 %v1585_v36, %v2189_v22  ;;  %v600_v39 = vpop.f32.mrb[5].mxu0 }
 0x150   : > { %v601_v40 = vadd.f32 %v2189_v22, %v600_v39  ;;  %v1586_v41 = vpop.f32.mrb[6].mxu0  ;;  %1603 = vmatprep.mubr.bf16.mxu1 %v623_v37 }
 0x151   : > { %v612_v42 = vadd.f32 %v1586_v41, %v2189_v22  ;;  %v603_v43 = vpop.f32.mrb[7].mxu0  ;;  %1604 = vmatmul.mubr.bf16.vlgmr.msra.gmra.mrb[0].mxu1 %v624_v35  ;;  %v621_v45 = vmax.f32 %v609_v38, 0.0 }
 0x152   : > { %v604_v44 = vadd.f32 %v2189_v22, %v603_v43  ;;  %1644 = vmatpush3.bf16.msra.mxu1 %v1748_v9  ;;  %v619_v47 = vmax.f32 %v601_v40, 0.0 }
 0x153   : > { %v622_v46 = vmax.f32 %v612_v42, 0.0  ;;  %1645 = vmatprep.subr.bf16.mxu1 %v2158_v11 }
 0x154   : > { %v620_v48 = vmax.f32 %v604_v44, 0.0 }
 0x155   : > { %v626_v49 = vpack.c.bf16 %v622_v46, %v621_v45 }
 0x156   : > { %v625_v50 = vpack.c.bf16 %v620_v48, %v619_v47  ;;  %1646 = vmatpush3.bf16.msra.mxu1 %v2158_v11 }
 0x157   : > { %1647 = vmatprep.subr.bf16.mxu1 %v1750_v14 }
 0x158   : > { %1607 = vmatprep.mubr.bf16.mxu1 %v625_v50 }
 0x159   : > { %1608 = vmatmul.mubr.bf16.gmra.mrb[4].mxu1 %v626_v49 }
 0x15a   : > { %1648 = vmatpush3.bf16.msra.mxu1 %v1750_v14 }
 0x15b   : > { %1649 = vmatprep.subr.bf16.mxu1 %v1751_v16 }
 0x15e   : > { %1650 = vmatpush3.bf16.msra.mxu1 %v1751_v16 }
 0x15f   : > { %1651 = vmatprep.subr.bf16.mxu1 %v1752_v18 }
 0x162   : > { %1652 = vmatpush3.bf16.msra.mxu1 %v1752_v18 }
 0x163   : > { %1653 = vmatprep.subr.bf16.mxu1 %v1753_v19 }
 0x166   : > { %1654 = vmatpush3.bf16.msra.mxu1 %v1753_v19 }
 0x167   : > { %1655 = vmatprep.subr.bf16.mxu1 %v1754_v20 }
 0x16a   : > { %1656 = vmatpush3.bf16.msra.mxu1 %v1754_v20 }
 0x16b   : > { %1657 = vmatprep.subr.bf16.mxu1 %v1755_v21 }
 0x16e   : > { %1658 = vmatpush3.bf16.msra.mxu1 %v1755_v21 }
 0x224   : > { %v1605_v61 = vpop.f32.mrb[0].mxu1 }
 0x225   : > { %v741_v62 = vadd.f32 %v1605_v61, %v2263_v60  ;;  %v732_v63 = vpop.f32.mrb[1].mxu1 }
 0x226   : > { %v733_v2 = vadd.f32 %v2263_v60, %v732_v63  ;;  %v1606_v3 = vpop.f32.mrb[2].mxu1 }
 0x227   : > { %v765_v4 = vmax.f32 %v741_v62, 0.0  ;;  %v744_v5 = vadd.f32 %v1606_v3, %v2263_v60  ;;  %v735_v6 = vpop.f32.mrb[3].mxu1 }
 0x228   : > { %v763_v7 = vmax.f32 %v733_v2, 0.0  ;;  %v736_v8 = vadd.f32 %v2263_v60, %v735_v6 }
 0x229   : > { %v783_v9 = vrot.slane %v765_v4, 4  ;;  %v766_v10 = vmax.f32 %v744_v5, 0.0 }
 0x22a   : > { %v771_v11 = vrot.slane %v763_v7, 4  ;;  %v764_v12 = vmax.f32 %v736_v8, 0.0 }
 0x22b   : > { %v784_v13 = vadd.f32 %v783_v9, %v765_v4  ;;  %v789_v14 = vrot.slane %v766_v10, 4 }
 0x22c   : > { %v772_v15 = vadd.f32 %v771_v11, %v763_v7  ;;  %v777_v16 = vrot.slane %v764_v12, 4  ;;  %v1609_v17 = vpop.f32.mrb[4].mxu1 }
 0x22d   : > { %v785_v18 = vrot.slane %v784_v13, 2  ;;  %v790_v19 = vadd.f32 %v789_v14, %v766_v10  ;;  %v757_v20 = vadd.f32 %v1609_v17, %v2263_v60  ;;  %v748_v21 = vpop.f32.mrb[5].mxu1 }
 0x22e   : > { %v773_v23 = vrot.slane %v772_v15, 2  ;;  %v778_v24 = vadd.f32 %v777_v16, %v764_v12  ;;  %v749_v25 = vadd.f32 %v2263_v60, %v748_v21  ;;  %v1610_v26 = vpop.f32.mrb[6].mxu1 }
 0x22f   : > { %v786_v27 = vadd.f32 %v785_v18, %v784_v13  ;;  %v791_v28 = vrot.slane %v790_v19, 2  ;;  %v769_v29 = vmax.f32 %v757_v20, 0.0  ;;  %v760_v30 = vadd.f32 %v1610_v26, %v2263_v60  ;;  %v751_v31 = vpop.f32.mrb[7].mxu1 }
 0x230   : > { %v774_v32 = vadd.f32 %v773_v23, %v772_v15  ;;  %v779_v33 = vrot.slane %v778_v24, 2  ;;  %v767_v34 = vmax.f32 %v749_v25, 0.0  ;;  %v752_v35 = vadd.f32 %v2263_v60, %v751_v31 }
 0x231   : > { %v787_v36 = vrot.slane %v786_v27, 1  ;;  %v792_v37 = vadd.f32 %v791_v28, %v790_v19  ;;  %v807_v38 = vrot.slane %v769_v29, 4  ;;  %v770_v39 = vmax.f32 %v760_v30, 0.0 }
 0x232   : > { %v775_v40 = vrot.slane %v774_v32, 1  ;;  %v780_v41 = vadd.f32 %v779_v33, %v778_v24  ;;  %v795_v42 = vrot.slane %v767_v34, 4  ;;  %v768_v43 = vmax.f32 %v752_v35, 0.0 }
 0x233   : > { %v788_v44 = vadd.f32 %v787_v36, %v786_v27  ;;  %v793_v45 = vrot.slane %v792_v37, 1  ;;  %v808_v46 = vadd.f32 %v807_v38, %v769_v29  ;;  %v813_v47 = vrot.slane %v770_v39, 4 }
 0x234   : > { %v776_v48 = vadd.f32 %v775_v40, %v774_v32  ;;  %v781_v49 = vrot.slane %v780_v41, 1  ;;  %v796_v50 = vadd.f32 %v795_v42, %v767_v34  ;;  %v801_v61 = vrot.slane %v768_v43, 4 }
 0x235   : > { %v822_v62 = vmul.f32 0.125, %v788_v44  ;;  %v794_v63 = vadd.f32 %v793_v45, %v792_v37  ;;  %v809_v2 = vrot.slane %v808_v46, 2  ;;  %v814_v3 = vadd.f32 %v813_v47, %v770_v39 }
 0x236   : > { %v820_v4 = vmul.f32 0.125, %v776_v48  ;;  %v782_v5 = vadd.f32 %v781_v49, %v780_v41  ;;  %v797_v6 = vrot.slane %v796_v50, 2  ;;  %v802_v7 = vadd.f32 %v801_v61, %v768_v43  ;;  %v979_v48 = vld [vmem:[%s2122_s15] sm:$0xff]  ;;  %v980_v49 = vld [vmem:[%s2122_s15 + $0x8] sm:$0xff] }
 0x237   : > { %v823_v8 = vmul.f32 0.125, %v794_v63  ;;  %v810_v9 = vadd.f32 %v809_v2, %v808_v46  ;;  %v815_v10 = vrot.slane %v814_v3, 2  ;;  %v830_v15 = vpack.c.bf16 %v822_v62, %v822_v62 }
 0x238   : > { %v828_v11 = vpack.c.bf16 %v820_v4, %v820_v4  ;;  %v821_v12 = vmul.f32 0.125, %v782_v5  ;;  %v798_v13 = vadd.f32 %v797_v6, %v796_v50  ;;  %v803_v14 = vrot.slane %v802_v7, 2  ;;  %v981_v4 = vld [vmem:[%s2122_s15 + $0x10] sm:$0xff]  ;;  %v982_v5 = vld [vmem:[%s2122_s15 + $0x18] sm:$0xff]  ;;  %v983_v6 = vld [vmem:[%s2122_s15 + $0x20] sm:$0xff] }
 0x239   : > { %v811_v16 = vrot.slane %v810_v9, 1  ;;  %v816_v17 = vadd.f32 %v815_v10, %v814_v3  ;;  %v831_v18 = vpack.c.bf16 %v823_v8, %v823_v8  ;;  %v869_v29 = vunpack.c.l.b16 %v830_v15  ;;  %v985_v10 = vld [vmem:[%s2122_s15 + $0x30] sm:$0xff] }
 0x23a   : > { %v829_v19 = vpack.c.bf16 %v821_v12, %v821_v12  ;;  %v799_v20 = vrot.slane %v798_v13, 1  ;;  %v804_v21 = vadd.f32 %v803_v14, %v802_v7  ;;  %v867_v25 = vunpack.c.l.b16 %v828_v11  ;;  %v984_v7 = vld [vmem:[%s2122_s15 + $0x28] sm:$0xff] }
 0x23b   : > { %v812_v23 = vadd.f32 %v811_v16, %v810_v9  ;;  %v817_v24 = vrot.slane %v816_v17, 1  ;;  %v870_v32 = vunpack.c.l.b16 %v831_v18  ;;  %v1517_v2 = vpack.c.bf16 %v980_v49, %v979_v48 }
 0x23c   : > { %v868_v26 = vunpack.c.l.b16 %v829_v19  ;;  %v800_v27 = vadd.f32 %v799_v20, %v798_v13  ;;  %v805_v28 = vrot.slane %v804_v21, 1  ;;  %v1518_v8 = vpack.c.bf16 %v982_v5, %v981_v4 }
 0x23d   : > { %v826_v30 = vmul.f32 0.125, %v812_v23  ;;  %v818_v31 = vadd.f32 %v817_v24, %v816_v17  ;;  %v1519_v9 = vpack.c.bf16 %v984_v7, %v983_v6 }
 0x23e   : > { %v876_v33 = vsel %vm875_vm2, %v868_v26, %v867_v25  ;;  %v824_v34 = vmul.f32 0.125, %v800_v27  ;;  %v806_v35 = vadd.f32 %v805_v28, %v804_v21 }
 0x23f   : > { %v878_v36 = vsel %vm877_vm3, %v869_v29, %v876_v33  ;;  %v827_v37 = vmul.f32 0.125, %v818_v31  ;;  %v834_v41 = vpack.c.bf16 %v826_v30, %v826_v30 }
 0x240   : > { %v832_v38 = vpack.c.bf16 %v824_v34, %v824_v34  ;;  %v880_v39 = vsel %vm879_vm4, %v870_v32, %v878_v36  ;;  %v825_v40 = vmul.f32 0.125, %v806_v35 }
 0x241   : > { %v835_v43 = vpack.c.bf16 %v827_v37, %v827_v37  ;;  %v873_v47 = vunpack.c.l.b16 %v834_v41 }
 0x242   : > { %v871_v42 = vunpack.c.l.b16 %v832_v38  ;;  %v833_v44 = vpack.c.bf16 %v825_v40, %v825_v40 }
 0x243   : > { %v874_v50 = vunpack.c.l.b16 %v835_v43 }
 0x244   : > { %v882_v45 = vsel %vm881_vm5, %v871_v42, %v880_v39  ;;  %v872_v46 = vunpack.c.l.b16 %v833_v44 }
 0x246   : > { %v884_v61 = vsel %vm883_vm6, %v872_v46, %v882_v45 }
 0x247   : > { %v886_v62 = vsel %vm885_vm7, %v873_v47, %v884_v61 }
 0x248   : > { %v888_v63 = vsel %vm887_vm8, %v874_v50, %v886_v62 }
 0x249   : > { %v889_v3 = vpack.c.b16 %v888_v63, %v888_v63 }
 0x24b   : > { %1628 = vmatmul.mubr.bf16.vlgmr.msra.gmra.mrb[8].mxu0 %v889_v3 }
 0x24c   : > { %1632 = vmatpush3.bf16.msra.mxu0 %v2135_v0  ;;  %1635 = vmatprep.mubr.msk.bf16.mxu0 %vm537_vm0, %v1517_v2  ;;  %v986_v0 = vld [vmem:[%s2122_s15 + $0x38] sm:$0xff] }
 0x24d   : > { %1633 = vmatprep.subr.bf16.mxu0 %v2140_v1  ;;  %v1520_v11 = vpack.c.bf16 %v986_v0, %v985_v10 }
 0x250   : > { %1634 = vmatpush3.bf16.msra.mxu0 %v2140_v1  ;;  %v2316_v1 = vld [vmem:[%s2383_s8] ss:$0 sm:$0xff] }
 0x251   : > { %1667 = vmatprep.subr.bf16.mxu0 %v1894_v52 }
 0x253   : > { %1636 = vmatmul.mubr.msk.bf16.vlgmr.msra.gmra.mrb[12].mxu0 %vm537_vm0, %v1518_v8 }
 0x254   : > { %1639 = vmatprep.mubr.msk.bf16.mxu0 %vm537_vm0, %v1519_v9  ;;  %1668 = vmatpush3.bf16.msra.mxu0 %v2204_v51 }
 0x255   : > { %1669 = vmatprep.subr.bf16.mxu0 %v1894_v52 }
 0x258   : > { %1670 = vmatpush3.bf16.msra.mxu0 %v2212_v53 }
 0x259   : > { %1671 = vmatprep.subr.bf16.mxu0 %v1894_v52 }
 0x25b   : > { %1640 = vmatmul.mubr.msk.bf16.gmra.mrb[16].mxu0 %vm537_vm0, %v1520_v11 }
 0x25c   : > { %1672 = vmatpush3.bf16.msra.mxu0 %v2219_v54  ;;  %1683 = vmatprep.mubr.msk.bf16.mxu0 %vm1895_vm1, %v1894_v52 }
 0x25d   : > { %1673 = vmatprep.subr.bf16.mxu0 %v1894_v52 }
 0x260   : > { %1674 = vmatpush3.bf16.msra.mxu0 %v2226_v55 }
 0x261   : > { %1675 = vmatprep.subr.bf16.mxu0 %v1894_v52 }
 0x264   : > { %1676 = vmatpush3.bf16.msra.mxu0 %v2233_v56 }
 0x265   : > { %1677 = vmatprep.subr.bf16.mxu0 %v1894_v52 }
 0x268   : > { %1678 = vmatpush3.bf16.msra.mxu0 %v2240_v57 }
 0x269   : > { %1679 = vmatprep.subr.bf16.mxu0 %v1894_v52 }
 0x26c   : > { %1680 = vmatpush3.bf16.msra.mxu0 %v2247_v58 }
 0x26d   : > { %1681 = vmatprep.subr.bf16.mxu0 %v1894_v52 }
 0x270   : > { %1682 = vmatpush3.bf16.msra.mxu0 %v2254_v59 }
 0x31e   : > { %v973_v51 = vpop.f32.mrb[8].mxu0 }
 0x31f   : > { %v2319_v53 = vadd.f32 %v2316_v1, %v973_v51  ;;  %v1629_v54 = vpop.f32.mrb[9].mxu0 }
 0x320   : > { %v976_v55 = vpop.f32.mrb[10].mxu0 }
 0x321   : > { %v1630_v56 = vpop.f32.mrb[11].mxu0  ;;  %v1310_v57 = vmul.f32 %v2319_v53, %v2319_v53 }
 0x323   : > { %v1311_v58 = vsel %vm537_vm0, %v1310_v57, 0.0 }
 0x324   : > { %1312 = vadd.xlane.f32.xlu0 %v1311_v58 }
 0x326   : > { %v1637_v52 = vpop.f32.mrb[12].mxu0 }
 0x327   : > { %v1070_v59 = vadd.f32 %v1637_v52, %v2189_v22  ;;  %v1061_v12 = vpop.f32.mrb[13].mxu0 }
 0x328   : > { %v1062_v13 = vadd.f32 %v2189_v22, %v1061_v12  ;;  %v1638_v14 = vpop.f32.mrb[14].mxu0 }
 0x329   : > { %v1073_v15 = vadd.f32 %v1638_v14, %v2189_v22  ;;  %v1064_v16 = vpop.f32.mrb[15].mxu0  ;;  %v1094_v18 = vmax.f32 %v1070_v59, 0.0 }
 0x32a   : > { %v1065_v17 = vadd.f32 %v2189_v22, %v1064_v16  ;;  %v1092_v20 = vmax.f32 %v1062_v13, 0.0 }
 0x32b   : > { %v1095_v19 = vmax.f32 %v1073_v15, 0.0 }
 0x32c   : > { %v1093_v21 = vmax.f32 %v1065_v17, 0.0 }
 0x32d   : > { %v1101_v23 = vpack.c.bf16 %v1095_v19, %v1094_v18 }
 0x32e   : > { %v1100_v24 = vpack.c.bf16 %v1093_v21, %v1092_v20  ;;  %v1641_v25 = vpop.f32.mrb[16].mxu0 }
 0x32f   : > { %v1086_v26 = vadd.f32 %v1641_v25, %v2189_v22  ;;  %v1077_v27 = vpop.f32.mrb[17].mxu0 }
 0x330   : > { %v1078_v28 = vadd.f32 %v2189_v22, %v1077_v27  ;;  %v1642_v29 = vpop.f32.mrb[18].mxu0  ;;  %1659 = vmatprep.mubr.bf16.mxu1 %v1100_v24 }
 0x331   : > { %v1089_v30 = vadd.f32 %v1642_v29, %v2189_v22  ;;  %v1080_v31 = vpop.f32.mrb[19].mxu0  ;;  %1660 = vmatmul.mubr.bf16.vlgmr.msra.gmra.mrb[8].mxu1 %v1101_v23  ;;  %v1098_v33 = vmax.f32 %v1086_v26, 0.0 }
 0x332   : > { %v1081_v32 = vadd.f32 %v2189_v22, %v1080_v31  ;;  %v1096_v35 = vmax.f32 %v1078_v28, 0.0 }
 0x333   : > { %v1099_v34 = vmax.f32 %v1089_v30, 0.0 }
 0x334   : > { %v1097_v36 = vmax.f32 %v1081_v32, 0.0 }
 0x335   : > { %v1103_v37 = vpack.c.bf16 %v1099_v34, %v1098_v33 }
 0x336   : > { %v1102_v38 = vpack.c.bf16 %v1097_v36, %v1096_v35 }
 0x338   : > { %1663 = vmatprep.mubr.bf16.mxu1 %v1102_v38 }
 0x339   : > { %1664 = vmatmul.mubr.bf16.gmra.mrb[12].mxu1 %v1103_v37 }
 0x404   : > { %v1661_v39 = vpop.f32.mrb[8].mxu1 }
 0x405   : > { %v1147_v40 = vadd.f32 %v1661_v39, %v2263_v60  ;;  %v1138_v41 = vpop.f32.mrb[9].mxu1 }
 0x406   : > { %v1139_v42 = vadd.f32 %v2263_v60, %v1138_v41  ;;  %v1662_v43 = vpop.f32.mrb[10].mxu1 }
 0x407   : > { %v1171_v44 = vmax.f32 %v1147_v40, 0.0  ;;  %v1150_v45 = vadd.f32 %v1662_v43, %v2263_v60  ;;  %v1141_v46 = vpop.f32.mrb[11].mxu1 }
 0x408   : > { %v1169_v22 = vmax.f32 %v1139_v42, 0.0  ;;  %v1142_v47 = vadd.f32 %v2263_v60, %v1141_v46 }
 0x409   : > { %v1189_v48 = vrot.slane %v1171_v44, 4  ;;  %v1172_v49 = vmax.f32 %v1150_v45, 0.0 }
 0x40a   : > { %v1177_v50 = vrot.slane %v1169_v22, 4  ;;  %v1170_v61 = vmax.f32 %v1142_v47, 0.0 }
 0x40b   : > { %v1190_v62 = vadd.f32 %v1189_v48, %v1171_v44  ;;  %v1195_v63 = vrot.slane %v1172_v49, 4 }
 0x40c   : > { %v1178_v2 = vadd.f32 %v1177_v50, %v1169_v22  ;;  %v1183_v3 = vrot.slane %v1170_v61, 4  ;;  %v1665_v4 = vpop.f32.mrb[12].mxu1 }
 0x40d   : > { %v1191_v5 = vrot.slane %v1190_v62, 2  ;;  %v1196_v6 = vadd.f32 %v1195_v63, %v1172_v49  ;;  %v1163_v7 = vadd.f32 %v1665_v4, %v2263_v60  ;;  %v1154_v8 = vpop.f32.mrb[13].mxu1 }
 0x40e   : > { %v1179_v9 = vrot.slane %v1178_v2, 2  ;;  %v1184_v10 = vadd.f32 %v1183_v3, %v1170_v61  ;;  %v1155_v0 = vadd.f32 %v2263_v60, %v1154_v8  ;;  %v1666_v11 = vpop.f32.mrb[14].mxu1 }
 0x40f   : > { %v1192_v51 = vadd.f32 %v1191_v5, %v1190_v62  ;;  %v1197_v54 = vrot.slane %v1196_v6, 2  ;;  %v1175_v55 = vmax.f32 %v1163_v7, 0.0  ;;  %v1166_v56 = vadd.f32 %v1666_v11, %v2263_v60  ;;  %v1157_v57 = vpop.f32.mrb[15].mxu1 }
 0x410   : > { %v1180_v58 = vadd.f32 %v1179_v9, %v1178_v2  ;;  %v1185_v52 = vrot.slane %v1184_v10, 2  ;;  %v1173_v59 = vmax.f32 %v1155_v0, 0.0  ;;  %v1158_v12 = vadd.f32 %v2263_v60, %v1157_v57 }
 0x411   : > { %v1193_v13 = vrot.slane %v1192_v51, 1  ;;  %v1198_v14 = vadd.f32 %v1197_v54, %v1196_v6  ;;  %v1213_v15 = vrot.slane %v1175_v55, 4  ;;  %v1176_v16 = vmax.f32 %v1166_v56, 0.0 }
 0x412   : > { %v1181_v17 = vrot.slane %v1180_v58, 1  ;;  %v1186_v18 = vadd.f32 %v1185_v52, %v1184_v10  ;;  %v1201_v19 = vrot.slane %v1173_v59, 4  ;;  %v1174_v20 = vmax.f32 %v1158_v12, 0.0 }
 0x413   : > { %v1194_v21 = vadd.f32 %v1193_v13, %v1192_v51  ;;  %v1199_v23 = vrot.slane %v1198_v14, 1  ;;  %v1214_v24 = vadd.f32 %v1213_v15, %v1175_v55  ;;  %v1219_v25 = vrot.slane %v1176_v16, 4 }
 0x414   : > { %v1182_v26 = vadd.f32 %v1181_v17, %v1180_v58  ;;  %v1187_v27 = vrot.slane %v1186_v18, 1  ;;  %v1202_v28 = vadd.f32 %v1201_v19, %v1173_v59  ;;  %v1207_v29 = vrot.slane %v1174_v20, 4 }
 0x415   : > { %v1227_v30 = vmul.f32 0.125, %v1194_v21  ;;  %v1200_v31 = vadd.f32 %v1199_v23, %v1198_v14  ;;  %v1215_v32 = vrot.slane %v1214_v24, 2  ;;  %v1220_v60 = vadd.f32 %v1219_v25, %v1176_v16 }
 0x416   : > { %v1225_v33 = vmul.f32 0.125, %v1182_v26  ;;  %v1188_v34 = vadd.f32 %v1187_v27, %v1186_v18  ;;  %v1203_v35 = vrot.slane %v1202_v28, 2  ;;  %v1208_v36 = vadd.f32 %v1207_v29, %v1174_v20 }
 0x417   : > { %v1228_v37 = vmul.f32 0.125, %v1200_v31  ;;  %v1216_v38 = vadd.f32 %v1215_v32, %v1214_v24  ;;  %v1221_v39 = vrot.slane %v1220_v60, 2  ;;  %v1235_v44 = vpack.c.bf16 %v1227_v30, %v1227_v30 }
 0x418   : > { %v1233_v40 = vpack.c.bf16 %v1225_v33, %v1225_v33  ;;  %v1226_v41 = vmul.f32 0.125, %v1188_v34  ;;  %v1204_v42 = vadd.f32 %v1203_v35, %v1202_v28  ;;  %v1209_v43 = vrot.slane %v1208_v36, 2 }
 0x419   : > { %v1217_v45 = vrot.slane %v1216_v38, 1  ;;  %v1222_v46 = vadd.f32 %v1221_v39, %v1220_v60  ;;  %v1236_v22 = vpack.c.bf16 %v1228_v37, %v1228_v37  ;;  %v1251_v4 = vunpack.c.l.b16 %v1235_v44 }
 0x41a   : > { %v1234_v47 = vpack.c.bf16 %v1226_v41, %v1226_v41  ;;  %v1205_v48 = vrot.slane %v1204_v42, 1  ;;  %v1210_v49 = vadd.f32 %v1209_v43, %v1208_v36  ;;  %v1249_v62 = vunpack.c.l.b16 %v1233_v40 }
 0x41b   : > { %v1218_v50 = vadd.f32 %v1217_v45, %v1216_v38  ;;  %v1223_v61 = vrot.slane %v1222_v46, 1  ;;  %v1252_v7 = vunpack.c.l.b16 %v1236_v22  ;;  %v1334_v36 = vstv %s1508_s16 }
 0x41c   : > { %v1250_v63 = vunpack.c.l.b16 %v1234_v47  ;;  %v1206_v2 = vadd.f32 %v1205_v48, %v1204_v42  ;;  %v1211_v3 = vrot.slane %v1210_v49, 1  ;;  %v1331_v38 = vstv %s1330_s30 }
 0x41d   : > { %v1231_v5 = vmul.f32 0.125, %v1218_v50  ;;  %v1224_v6 = vadd.f32 %v1223_v61, %v1222_v46  ;;  %v1338_v43 = vstv %s1337_s12 }
 0x41e   : > { %v1257_v8 = vsel %vm875_vm2, %v1250_v63, %v1249_v62  ;;  %v1229_v9 = vmul.f32 0.125, %v1206_v2  ;;  %v1212_v10 = vadd.f32 %v1211_v3, %v1210_v49 }
 0x41f   : > { %v1258_v0 = vsel %vm877_vm3, %v1251_v4, %v1257_v8  ;;  %v1232_v11 = vmul.f32 0.125, %v1224_v6  ;;  %v1239_v56 = vpack.c.bf16 %v1231_v5, %v1231_v5 }
 0x420   : > { %v1237_v51 = vpack.c.bf16 %v1229_v9, %v1229_v9  ;;  %v1259_v54 = vsel %vm879_vm4, %v1252_v7, %v1258_v0  ;;  %v1230_v55 = vmul.f32 0.125, %v1212_v10 }
 0x421   : > { %v1240_v58 = vpack.c.bf16 %v1232_v11, %v1232_v11  ;;  %v1255_v13 = vunpack.c.l.b16 %v1239_v56 }
 0x422   : > { %v1253_v57 = vunpack.c.l.b16 %v1237_v51  ;;  %v1238_v52 = vpack.c.bf16 %v1230_v55, %v1230_v55 }
 0x423   : > { %v1256_v14 = vunpack.c.l.b16 %v1240_v58 }
 0x424   : > { %v1260_v59 = vsel %vm881_vm5, %v1253_v57, %v1259_v54  ;;  %v1254_v12 = vunpack.c.l.b16 %v1238_v52 }
 0x426   : > { %v1261_v15 = vsel %vm883_vm6, %v1254_v12, %v1260_v59 }
 0x427   : > { %v1262_v16 = vsel %vm885_vm7, %v1255_v13, %v1261_v15 }
 0x428   : > { %v1263_v17 = vsel %vm887_vm8, %v1256_v14, %v1262_v16 }
 0x429   : > { %v1264_v18 = vpack.c.b16 %v1263_v17, %v1263_v17 }
 0x42b   : > { %1684 = vmatmul.mubr.bf16.vlgmr.msra.gmra.mrb[20].mxu0 %v1264_v18 }
 0x4fe   : > { %v1300_v19 = vpop.f32.mrb[20].mxu0 }
 0x4ff   : > { %v1301_v20 = vadd.f32 %v2316_v1, %v1300_v19  ;;  %v1685_v21 = vpop.f32.mrb[21].mxu0  ;;  %v1323_v1 = vld [vmem:[%s472_s25] sm:$0xff] }
 0x500   : > { %v1303_v23 = vpop.f32.mrb[22].mxu0  ;;  %v1507_v29 = vmul.f32 -1.442695, %v1323_v1 }
 0x501   : > { %v1686_v24 = vpop.f32.mrb[23].mxu0  ;;  %v1315_v25 = vmul.f32 %v1301_v20, %v1301_v20  ;;  %v1306_v26 = vmul.f32 %v1301_v20, %v2319_v53  ;;  %v1313_v53 = vpop.xlane.xlu0 %1312 }
 0x502   : > { %1764 = vpow2.f32 %v1507_v29  ;;  %v1314_v60 = vmax.f32 %v1313_v53, 1e-16 }
 0x503   : > { %v1316_v27 = vsel %vm537_vm0, %v1315_v25, 0.0  ;;  %v1307_v28 = vsel %vm537_vm0, %v1306_v26, 0.0 }
 0x504   : > { %1317 = vadd.xlane.f32.xlu0 %v1316_v27  ;;  %1308 = vadd.xlane.f32.xlu1 %v1307_v28 }
 0x50c   : > { %v1765_v30 = vpop.eup %1764 }
 0x50d   : > { %v1327_v31 = vadd.f32 1.0, %v1765_v30 }
 0x50f   : > { %1766 = vrcp.f32 %v1327_v31 }
 0x519   : > { %v1767_v35 = vpop.eup %1766 }
 0x51a   : > { %v1335_v41 = vmul.f32 %v1767_v35, %v1334_v36 }
 0x591   : > { %v1318_v32 = vpop.xlane.xlu0 %1317  ;;  %v1309_v39 = vpop.xlane.xlu1 %1308 }
 0x592   : > { %v1319_v33 = vmax.f32 %v1318_v32, 1e-16 }
 0x594   : > { %v1320_v34 = vmul.f32 %v1319_v33, %v1314_v60 }
 0x596   : > { %1768 = vrsqrt.f32 %v1320_v34 }
 0x5a0   : > { %v1769_v37 = vpop.eup %1768 }
 0x5a1   : > { %v1322_v40 = vmul.f32 %v1769_v37, %v1309_v39 }
 0x5a3   : > { %v1332_v42 = vmul.f32 %v1331_v38, %v1322_v40 }
 0x5a5   : > { %v1336_v44 = vadd.f32 %v1335_v41, %v1332_v42 }
 0x5a7   : > { %v1339_v45 = vadd.f32 %v1338_v43, %v1336_v44 }
 0x5a9   : > { %1341 = vst.msk [vmem:[%s476_s21] sm:$0xff] %vm1340_vm9, %v1339_v45 }
 0x5aa PF: > { %s2404_s22 = sld [smem:[#allocation12_spill]]  ;;  %s2405_s21 = sld [smem:[#allocation13_spill]] }
 0x5ab   : > { %p26_p13 = scmp.ge.s32.totalorder %s1981_s23, 4   ;;  %s2406_s19 = smov %s1879_s20 }
 0x5ad   :  { %28 = sbr.rel (!%p26_p13) target bundleno = 10 (0xa), region = 125 }
 0x5b0   : > { %s2407_s20 = smov %s2404_s22  ;;  %s2408_s22 = smov %s1981_s23 }
 0x5b4   :  { %1361 = vsyncpa [#allocation4], 1 }
 0x5b5   :  { %1363 = vsyncpa [#allocation4 + $0x1], 1 }
 0x5b6   :  { %1364 = vsyncpa [#allocation7], 1 }
 0x5b7   :  { %1366 = vsyncpa [#allocation7 + $0x1], 1 }
 0x5b8   :  { %1367 = vsyncpa [#allocation5], 1 }
 0x5b9   :  { %1369 = vsyncpa [#allocation5 + $0x1], 1 }

// kernel: tpu_custom_call.1
= control target key start
LH: loop header
LB: loop body
LE: loop exit
PB: predicated region body
PF: predicated region fallthrough
CT: control target
= control target key end

     0   :  { %s2375_s0 = inlined_call_operand.hbm [shape: f32[2,8,8,32], index: 0, kind: input, shape index: {}]   ;;  %s2376_s1 = inlined_call_operand.hbm [shape: f32[2,8,8,32], index: 1, kind: input, shape index: {}]   ;;  %s2377_s2 = inlined_call_operand.vmem [shape: f32[2,8,1], index: 2, kind: input, shape index: {}]   ;;  %s2378_s3 = inlined_call_operand.vmem [shape: bf16[32,128], index: 3, kind: input, shape index: {}]   ;;  %s2379_s4 = inlined_call_operand.vmem [shape: f32[1,128], index: 4, kind: input, shape index: {}]   ;;  %s2380_s5 = inlined_call_operand.vmem [shape: bf16[128,128], index: 5, kind: input, shape index: {}]   ;;  %s2381_s6 = inlined_call_operand.vmem [shape: f32[1,128], index: 6, kind: input, shape index: {}]   ;;  %s2382_s7 = inlined_call_operand.vmem [shape: bf16[128,32], index: 7, kind: input, shape index: {}]   ;;  %s2383_s8 = inlined_call_operand.vmem [shape: f32[1,32], index: 8, kind: input, shape index: {}]   ;;  %s2384_s9 = inlined_call_operand.vmem [shape: f32[2], index: 9, kind: input, shape index: {}]   ;;  %s2385_s10 = inlined_call_operand.<no memory space> [shape: f32[1], index: 10, kind: input, shape index: {}]   ;;  %s2386_s11 = inlined_call_operand.vmem [shape: f32[2,8,1], index: 11, kind: output, shape index: {}]  }
   0x1   :  { %2391 = sst [smem:[#allocation14_spill]] %s2375_s0 }
   0x2   :  { %2392 = sst [smem:[#allocation15_spill]] %s2384_s9 }
   0x3   :  { %16 = sst [smem:[#allocation2]] %s2385_s10 }
   0x4   :  { %17 = vsyncpa [#allocation4], 0 }
   0x5   :  { %19 = vsyncpa [#allocation4 + $0x1], 0 }
   0x6   :  { %20 = vsyncpa [#allocation7], 0 }
   0x7   :  { %22 = vsyncpa [#allocation7 + $0x1], 0 }
   0x8   :  { %23 = vsyncpa [#allocation5], 0  ;;  %s1959_s19 = smov 0   ;;  %s1961_s20 = smov 0  }
   0x9   :  { %s1963_s21 = smov 0   ;;  %s1965_s22 = smov 0  }
   0xa LB: > { %2393 = sst [smem:[#allocation12_spill]] %s1883_s21  ;;  %s1978_s10 = sadd.s32 4294967295, %s1887_s22   ;;  %s1887_s22 = sphi %s1965_s22, %s2408_s22   ;;  %s1883_s21 = sphi %s1963_s21, %s2405_s21   ;;  %s1879_s20 = sphi %s1961_s20, %s2407_s20   ;;  %s1875_s19 = sphi %s1959_s19, %s2406_s19  }
   0xb   : > { %s1981_s23 = sadd.s32 1, %s1887_s22   ;;  %s36_s25 = sadd.s32 1, %s1883_s21 }
   0xc   : > { %s33_s24 = ssub.s32 %s1887_s22, %s1981_s23  ;;  %p43_p1 = scmp.ne.s32.totalorder %s1883_s21, %s1879_s20 }
   0xd   : > { %p34_p0 = scmp.eq.s32.totalorder %s33_s24, 0  ;;  %p44_p2 = scmp.eq.s32.totalorder %s1887_s22, 0 }
   0xe   : > { %p49_p3 = scmp.ne.s32.totalorder %s1879_s20, %s1875_s19  ;;  %p50_p5 = scmp.eq.s32.totalorder %s1978_s10, 0 }
   0xf   : > { %s1991_s26 = scalar_select %p34_p0, %s1883_s21, %s36_s25  }
  0x10   : > { %p45_p4 = por %p44_p2, %p43_p1  ;;  %p1455_p6 = scmp.ge.s32.totalorder %s1887_s22, 1 }
  0x11   : > { %2394 = sst [smem:[#allocation13_spill]] %s1991_s26  ;;  %p306_p7 = scmp.lt.s32.totalorder %s1887_s22, 3 }
  0x12   : > { %p1998_p8 = por %p50_p5, %p49_p3  ;;  %s2397_s9 = sld [smem:[#allocation15_spill]] }
  0x13   : > { %p2002_p9 = pnand %p1455_p6, %p306_p7  ;;  %p1707_p11 = scmp.lt.s32.totalorder %s1887_s22, 2 }
  0x14   : > { %s2395_s27 = scalar_select %p1998_p8, 1, 0 }
  0x15   : > { %s2396_s28 = scalar_select %p2002_p9, 1, 0 }
  0x16   : > { %p1695_p10 = pneg %p2002_p9  ;;  %s2013_s13 = sand.u32 1, %s1883_s21  }
  0x17   : > { %p2021_p13 = pnand %p1707_p11, %p45_p4  ;;  %s1458_s16 = sshll.u32 %s2013_s13, 6 }
  0x18   : > { %s337_s12 = sshll.u32 %s2397_s9, 4  ;;  %p2017_p12 = pnand %p1695_p10, %p50_p5  ;;  %s338_s12 = int_to_ptr.vmem [resolvable:$true] %s337_s12 }
  0x19   : > { %s1770_s17 = scalar_lea.vmem %s338_s12, 16  ;;  %p1778_p6 = scmp.lt.s32.totalorder %s338_s12, %s338_s12 }
  0x1a   : > { %p1771_p0 = scmp.ne.s32.totalorder %s338_s12, %s1770_s17  ;;  %p1772_p1 = pneg %p2017_p12 }
  0x1b   : > { %p1779_p7 = scmp.lt.s32.totalorder %s1770_s17, %s1770_s17 }
  0x1c   : > { %p1773_p2 = pnand %p1772_p1, %p1771_p0 }
  0x1d   : > { %p1780_p8 = por %p1779_p7, %p1778_p6 }
  0x1e   : > { %p1774_p3 = pneg %p1773_p2 }
  0x20   : > { %p1781_p9 = pnand %p1780_p8, %p1774_p3 }
  0x22   : > { %1784 = shalt.err (!%p1781_p9)
}
  0x23   : > { %s1889_s18 = smov [#allocation8]   ;;  %s2389_s19 = sshll.u32 %s1887_s22, 10 }
  0x24   : > { %1698 = dma.vmem_to_smem (!%p2017_p12), %s338_s12, 16, %s1889_s18, [#allocation5]  }
  0x25   : > { %s2400_s0 = sld [smem:[#allocation14_spill]]  ;;  %s355_s30 = scalar_lea.vmem [#allocation3], %s1458_s16 }
  0x26   : > { %s362_s14 = sshll.u32 %s355_s30, 4  ;;  %s352_s17 = scalar_lea.sflag [#allocation4], %s2013_s13  ;;  %s2040_s14 = int_to_ptr.vmem [resolvable:$true] %s362_s14 }
  0x27   : > { %p1787_p8 = pneg %p2021_p13 }
  0x2b   : > { %s2036_s29 = scalar_lea.hbm %s2400_s0, %s2389_s19  ;;  %s1790_s24 = scalar_lea.hbm %s2400_s0, 2048 }
  0x2c   : > { %s1785_s9 = scalar_lea.hbm %s2036_s29, 1024  ;;  %p1791_p11 = scmp.lt.u32.totalorder %s2036_s29, %s2400_s0 }
  0x2d   : > { %p1786_p4 = scmp.ne.s32.totalorder %s2036_s29, %s1785_s9  ;;  %p1792_p12 = scmp.lt.u32.totalorder %s1790_s24, %s1785_s9 }
  0x2e   : > { %p1794_p1 = scmp.lt.u32.totalorder %s1785_s9, %s2036_s29 }
  0x2f   : > { %p1788_p9 = pnand %p1787_p8, %p1786_p4  ;;  %p1793_p0 = por %p1792_p12, %p1791_p11 }
  0x31   : > { %p1789_p10 = pneg %p1788_p9  ;;  %p1795_p2 = por %p1794_p1, %p1793_p0 }
  0x33   : > { %p1796_p3 = pnand %p1795_p2, %p1789_p10 }
  0x35   : > { %1799 = shalt.err (!%p1796_p3)
}
  0x36   : > { %s1800_s30 = scalar_lea.vmem %s2040_s14, 1024  ;;  %s1890_s12 = smov [#allocation3]  }
  0x37   : > { %p1801_p6 = scmp.ne.s32.totalorder %s2040_s14, %s1800_s30  ;;  %s1805_s18 = sshll.u32 %s1890_s12, 4  ;;  %s1806_s18 = int_to_ptr.vmem [resolvable:$false] %s1805_s18 }
  0x38   : > { %s1807_s19 = scalar_lea.vmem %s1806_s18, 2048  ;;  %p1808_p9 = scmp.lt.s32.totalorder %s2040_s14, %s1806_s18 }
  0x39   : > { %p1803_p7 = pnand %p1801_p6, %p1787_p8  ;;  %p1809_p11 = scmp.lt.s32.totalorder %s1807_s19, %s1800_s30 }
  0x3b   : > { %p1804_p4 = pneg %p1803_p7  ;;  %p1810_p12 = por %p1809_p11, %p1808_p9 }
  0x3d   : > { %p1811_p0 = pnand %p1810_p12, %p1804_p4 }
  0x3f   : > { %1814 = shalt.err (!%p1811_p0)
}
  0x40   : > { %s1891_s9 = smov 128   ;;  %s1892_s24 = smov 8  }
  0x41   : > { %1702 = dma.hbm_to_vmem [thread:$0]  (!%p2021_p13), %s2036_s29, 1024, %s2040_s14, %s352_s17, %s1891_s9, %s1891_s9, %s1892_s24  }
  0x42   : > { %s2401_s25 = sshll.u32 %s1887_s22, 10  ;;  %s376_s19 = scalar_lea.vmem [#allocation6], %s1458_s16 }
  0x43   : > { %s2078_s18 = scalar_lea.hbm %s2376_s1, %s2401_s25  ;;  %s383_s0 = sshll.u32 %s376_s19, 4  ;;  %s2082_s0 = int_to_ptr.vmem [resolvable:$true] %s383_s0 }
  0x44   : > { %s373_s26 = scalar_lea.sflag [#allocation7], %s2013_s13  ;;  %s1815_s21 = scalar_lea.hbm %s2078_s18, 1024 }
  0x45   : > { %p1816_p10 = scmp.ne.s32.totalorder %s2078_s18, %s1815_s21  ;;  %s1820_s14 = scalar_lea.hbm %s2376_s1, 2048 }
  0x46   : > { %p1821_p3 = scmp.lt.u32.totalorder %s2078_s18, %s2376_s1  ;;  %p1822_p6 = scmp.lt.u32.totalorder %s1820_s14, %s1815_s21 }
  0x47   : > { %p1818_p1 = pnand %p1816_p10, %p1787_p8  ;;  %p1824_p4 = scmp.lt.u32.totalorder %s1815_s21, %s2078_s18 }
  0x48   : > { %p1823_p7 = por %p1822_p6, %p1821_p3 }
  0x49   : > { %p1819_p2 = pneg %p1818_p1 }
  0x4a   : > { %p1825_p9 = por %p1824_p4, %p1823_p7 }
  0x4c   : > { %p1826_p11 = pnand %p1825_p9, %p1819_p2 }
  0x4e   : > { %1829 = shalt.err (!%p1826_p11)
}
  0x4f   : > { %s1830_s16 = scalar_lea.vmem %s2082_s0, 1024  ;;  %s1893_s30 = smov [#allocation6]  }
  0x50   : > { %p1831_p12 = scmp.ne.s32.totalorder %s2082_s0, %s1830_s16  ;;  %s1835_s12 = sshll.u32 %s1893_s30, 4  ;;  %s1836_s12 = int_to_ptr.vmem [resolvable:$false] %s1835_s12 }
  0x51   : > { %s1837_s19 = scalar_lea.vmem %s1836_s12, 2048  ;;  %p1838_p1 = scmp.lt.s32.totalorder %s2082_s0, %s1836_s12 }
  0x52   : > { %p1833_p0 = pnand %p1831_p12, %p1787_p8  ;;  %p1839_p3 = scmp.lt.s32.totalorder %s1837_s19, %s1830_s16 }
  0x54   : > { %p1834_p10 = pneg %p1833_p0  ;;  %p1840_p6 = por %p1839_p3, %p1838_p1 }
  0x56   : > { %p1841_p7 = pnand %p1840_p6, %p1834_p10 }
  0x58   : > { %1844 = shalt.err (!%p1841_p7)
}
  0x59   : > { %1705 = dma.hbm_to_vmem [thread:$0]  (!%p2021_p13), %s2078_s18, 1024, %s2082_s0, %s373_s26, %s1891_s9, %s1891_s9, %s1892_s24  }
  0x5a   : > { %p2402_p8 = scmp.ne.s32.totalorder %s2396_s28, 0 }
  0x5b   : > { %s404_s21 = sand.u32 (!%p2402_p8), 1, %s1879_s20   ;;  %p2403_p2 = scmp.ne.s32.totalorder (!%p2402_p8), %s2395_s27, 0 }
  0x5c   : > { %402 = sbr.rel (%p2402_p8) target bundleno = 1450 (0x5aa), region = 64  ;;  %s1465_s22 = sshll.u32 (!%p2402_p8), %s404_s21, 6 }
  0x5d   : > { %s405_s29 = scalar_lea.sflag (!%p2402_p8), [#allocation4], %s404_s21  ;;  %s2116_s14 = scalar_lea.vmem (!%p2402_p8), [#allocation3], %s1465_s22 }
  0x63   : > { %1862 = dma.done.wait (%p2403_p2), %s405_s29, 1024  }
  0x64   : > { %1864 = vsyncadd (%p2403_p2), %s405_s29, 4294966272  ;;  %s414_s13 = scalar_lea.sflag [#allocation7], %s404_s21  ;;  %s2122_s15 = scalar_lea.vmem [#allocation6], %s1465_s22 }
  0x65   : > { %1866 = dma.done.wait (%p2403_p2), %s414_s13, 1024  }
  0x66   : > { %1868 = vsyncadd (%p2403_p2), %s414_s13, 4294966272 }
  0x67   : > { %1870 = dma.done.wait (%p50_p5), [#allocation5], 16  }
  0x68   : > { %1872 = vsyncadd (%p50_p5), [#allocation5], 4294967280 }
  0x69   : > { %426 = sfence }
  0x6a   : > { %v2135_v0 = vld [vmem:[%s2378_s3] sm:$0xff]   ;;  %v2140_v1 = vld [vmem:[%s2378_s3 + $0x8] sm:$0xff]   ;;  %vm537_vm0 = vcmask 261120   ;;  %v480_v5 = vld [vmem:[%s2116_s14 + $0x10] sm:$0xff]  ;;  %v1894_v52 = vmov 0.0   ;;  %vm1895_vm1 = vmmov 0  }
  0x6b   : > { %1575 = vmatprep.subr.bf16.mxu0 %v2135_v0  ;;  %v478_v2 = vld [vmem:[%s2116_s14] sm:$0xff]  ;;  %v479_v3 = vld [vmem:[%s2116_s14 + $0x8] sm:$0xff]  ;;  %v481_v6 = vld [vmem:[%s2116_s14 + $0x18] sm:$0xff]  ;;  %vm875_vm2 = vcmask 1041409   ;;  %vm877_vm3 = vcmask 1042434   ;;  %vm879_vm4 = vcmask 1043459  }
  0x6c   : > { %1576 = vmatpush3.bf16.msra.mxu0 %v2135_v0  ;;  %v1513_v4 = vpack.c.bf16 %v479_v3, %v478_v2  ;;  %v482_v7 = vld [vmem:[%s2116_s14 + $0x20] sm:$0xff]  ;;  %v483_v8 = vld [vmem:[%s2116_s14 + $0x28] sm:$0xff]  ;;  %v1514_v10 = vpack.c.bf16 %v481_v6, %v480_v5  ;;  %v484_v13 = vld [vmem:[%s2116_s14 + $0x30] sm:$0xff]  ;;  %vm881_vm5 = vcmask 1044484   ;;  %vm883_vm6 = vcmask 1045509   ;;  %p469_p5 = scmp.lt.s32.totalorder %s1978_s10, 1 }
  0x6d   : > { %1577 = vmatprep.subr.bf16.mxu0 %v2140_v1  ;;  %v1748_v9 = vld [vmem:[%s2380_s5] sm:$0xff]   ;;  %v2158_v11 = vld [vmem:[%s2380_s5 + $0x8] sm:$0xff]   ;;  %v1515_v12 = vpack.c.bf16 %v483_v8, %v482_v7  ;;  %v1750_v14 = vld [vmem:[%s2380_s5 + $0x10] sm:$0xff]   ;;  %vm885_vm7 = vcmask 1046534   ;;  %vm887_vm8 = vcmask 1047559   ;;  %s1508_s16 = sld [smem:[#allocation8 + $0x1]] }
  0x6e   : > { %1579 = vmatprep.mubr.msk.bf16.mxu0 %vm537_vm0, %v1513_v4  ;;  %1587 = vmatprep.subr.bf16.mxu1 %v1748_v9  ;;  %v485_v15 = vld [vmem:[%s2116_s14 + $0x38] sm:$0xff]  ;;  %v1752_v18 = vld [vmem:[%s2380_s5 + $0x20] sm:$0xff]   ;;  %v1753_v19 = vld [vmem:[%s2380_s5 + $0x28] sm:$0xff]   ;;  %s2410_s10 = smov (!%p469_p5, %s1978_s10), 1  ;;  %s1330_s30 = sld [smem:[#allocation8]]  ;;  %vm1340_vm9 = vcmask 7168  }
  0x6f   : > { %1588 = vmatpush3.bf16.msra.mxu1 %v1748_v9  ;;  %v1751_v16 = vld [vmem:[%s2380_s5 + $0x18] sm:$0xff]   ;;  %v1516_v17 = vpack.c.bf16 %v485_v15, %v484_v13  ;;  %v1754_v20 = vld [vmem:[%s2380_s5 + $0x30] sm:$0xff]   ;;  %v2189_v22 = vld [vmem:[%s2379_s4] ss:$0 sm:$0xff]  ;;  %s1468_s24 = sshll.u32 %s2410_s10, 3  ;;  %s1337_s12 = sld [smem:[#allocation2]] }
  0x70   : > { %1578 = vmatpush3.bf16.msra.mxu0 %v2140_v1  ;;  %1589 = vmatprep.subr.bf16.mxu1 %v2158_v11  ;;  %v1755_v21 = vld [vmem:[%s2380_s5 + $0x38] sm:$0xff]   ;;  %v2204_v51 = vld [vmem:[%s2382_s7] sm:$0xff]   ;;  %v2212_v53 = vld [vmem:[%s2382_s7 + $0x8] sm:$0xff]   ;;  %s472_s25 = scalar_lea.vmem %s2377_s2, %s1468_s24  ;;  %s476_s21 = scalar_lea.vmem %s2386_s11, %s1468_s24 }
  0x71   : > { %1611 = vmatprep.subr.bf16.mxu0 %v1894_v52  ;;  %v2219_v54 = vld [vmem:[%s2382_s7 + $0x10] sm:$0xff]   ;;  %v2226_v55 = vld [vmem:[%s2382_s7 + $0x18] sm:$0xff]   ;;  %v2233_v56 = vld [vmem:[%s2382_s7 + $0x20] sm:$0xff]  }
  0x72   : > { %v2240_v57 = vld [vmem:[%s2382_s7 + $0x28] sm:$0xff]   ;;  %v2247_v58 = vld [vmem:[%s2382_s7 + $0x30] sm:$0xff]   ;;  %v2254_v59 = vld [vmem:[%s2382_s7 + $0x38] sm:$0xff]  }
  0x73   : > { %1580 = vmatmul.mubr.msk.bf16.vlgmr.msra.gmra.mrb[0].mxu0 %vm537_vm0, %v1514_v10  ;;  %1590 = vmatpush3.bf16.msra.mxu1 %v2158_v11  ;;  %v2263_v60 = vld [vmem:[%s2381_s6] ss:$0 sm:$0xff] }
  0x74   : > { %1583 = vmatprep.mubr.msk.bf16.mxu0 %vm537_vm0, %v1515_v12  ;;  %1591 = vmatprep.subr.bf16.mxu1 %v1750_v14 }
  0x75   : > { %1612 = vmatpush3.bf16.msra.mxu0 %v2204_v51 }
  0x76   : > { %1613 = vmatprep.subr.bf16.mxu0 %v1894_v52 }
  0x77   : > { %1592 = vmatpush3.bf16.msra.mxu1 %v1750_v14 }
  0x78   : > { %1593 = vmatprep.subr.bf16.mxu1 %v1751_v16 }
  0x79   : > { %1614 = vmatpush3.bf16.msra.mxu0 %v2212_v53 }
  0x7a   : > { %1615 = vmatprep.subr.bf16.mxu0 %v1894_v52 }
  0x7b   : > { %1584 = vmatmul.mubr.msk.bf16.gmra.mrb[4].mxu0 %vm537_vm0, %v1516_v17  ;;  %1594 = vmatpush3.bf16.msra.mxu1 %v1751_v16 }
  0x7c   : > { %1595 = vmatprep.subr.bf16.mxu1 %v1752_v18  ;;  %1627 = vmatprep.mubr.msk.bf16.mxu0 %vm1895_vm1, %v1894_v52 }
  0x7d   : > { %1616 = vmatpush3.bf16.msra.mxu0 %v2219_v54 }
  0x7e   : > { %1617 = vmatprep.subr.bf16.mxu0 %v1894_v52 }
  0x7f   : > { %1596 = vmatpush3.bf16.msra.mxu1 %v1752_v18 }
  0x80   : > { %1597 = vmatprep.subr.bf16.mxu1 %v1753_v19 }
  0x81   : > { %1618 = vmatpush3.bf16.msra.mxu0 %v2226_v55 }
  0x82   : > { %1619 = vmatprep.subr.bf16.mxu0 %v1894_v52 }
  0x83   : > { %1598 = vmatpush3.bf16.msra.mxu1 %v1753_v19 }
  0x84   : > { %1599 = vmatprep.subr.bf16.mxu1 %v1754_v20 }
  0x85   : > { %1620 = vmatpush3.bf16.msra.mxu0 %v2233_v56 }
  0x86   : > { %1621 = vmatprep.subr.bf16.mxu0 %v1894_v52 }
  0x87   : > { %1600 = vmatpush3.bf16.msra.mxu1 %v1754_v20 }
  0x88   : > { %1601 = vmatprep.subr.bf16.mxu1 %v1755_v21 }
  0x89   : > { %1622 = vmatpush3.bf16.msra.mxu0 %v2240_v57 }
  0x8a   : > { %1623 = vmatprep.subr.bf16.mxu0 %v1894_v52 }
  0x8b   : > { %1602 = vmatpush3.bf16.msra.mxu1 %v1755_v21 }
  0x8c   : > { %1643 = vmatprep.subr.bf16.mxu1 %v1748_v9 }
  0x8d   : > { %1624 = vmatpush3.bf16.msra.mxu0 %v2247_v58 }
  0x8e   : > { %1625 = vmatprep.subr.bf16.mxu0 %v1894_v52 }
  0x91   : > { %1626 = vmatpush3.bf16.msra.mxu0 %v2254_v59 }
  0x92   : > { %1631 = vmatprep.subr.bf16.mxu0 %v2135_v0 }
 0x146   : > { %v1581_v23 = vpop.f32.mrb[0].mxu0 }
 0x147   : > { %v593_v24 = vadd.f32 %v1581_v23, %v2189_v22  ;;  %v584_v25 = vpop.f32.mrb[1].mxu0 }
 0x148   : > { %v585_v26 = vadd.f32 %v2189_v22, %v584_v25  ;;  %v1582_v27 = vpop.f32.mrb[2].mxu0 }
 0x149   : > { %v596_v28 = vadd.f32 %v1582_v27, %v2189_v22  ;;  %v587_v29 = vpop.f32.mrb[3].mxu0  ;;  %v617_v31 = vmax.f32 %v593_v24, 0.0 }
 0x14a   : > { %v588_v30 = vadd.f32 %v2189_v22, %v587_v29  ;;  %v615_v33 = vmax.f32 %v585_v26, 0.0 }
 0x14b   : > { %v618_v32 = vmax.f32 %v596_v28, 0.0 }
 0x14c   : > { %v616_v34 = vmax.f32 %v588_v30, 0.0 }
 0x14d   : > { %v624_v35 = vpack.c.bf16 %v618_v32, %v617_v31 }
 0x14e   : > { %v1585_v36 = vpop.f32.mrb[4].mxu0  ;;  %v623_v37 = vpack.c.bf16 %v616_v34, %v615_v33 }
 0x14f   : > { %v609_v38 = vadd.f32 %v1585_v36, %v2189_v22  ;;  %v600_v39 = vpop.f32.mrb[5].mxu0 }
 0x150   : > { %v601_v40 = vadd.f32 %v2189_v22, %v600_v39  ;;  %v1586_v41 = vpop.f32.mrb[6].mxu0  ;;  %1603 = vmatprep.mubr.bf16.mxu1 %v623_v37 }
 0x151   : > { %v612_v42 = vadd.f32 %v1586_v41, %v2189_v22  ;;  %v603_v43 = vpop.f32.mrb[7].mxu0  ;;  %1604 = vmatmul.mubr.bf16.vlgmr.msra.gmra.mrb[0].mxu1 %v624_v35  ;;  %v621_v45 = vmax.f32 %v609_v38, 0.0 }
 0x152   : > { %v604_v44 = vadd.f32 %v2189_v22, %v603_v43  ;;  %1644 = vmatpush3.bf16.msra.mxu1 %v1748_v9  ;;  %v619_v47 = vmax.f32 %v601_v40, 0.0 }
 0x153   : > { %v622_v46 = vmax.f32 %v612_v42, 0.0  ;;  %1645 = vmatprep.subr.bf16.mxu1 %v2158_v11 }
 0x154   : > { %v620_v48 = vmax.f32 %v604_v44, 0.0 }
 0x155   : > { %v626_v49 = vpack.c.bf16 %v622_v46, %v621_v45 }
 0x156   : > { %v625_v50 = vpack.c.bf16 %v620_v48, %v619_v47  ;;  %1646 = vmatpush3.bf16.msra.mxu1 %v2158_v11 }
 0x157   : > { %1647 = vmatprep.subr.bf16.mxu1 %v1750_v14 }
 0x158   : > { %1607 = vmatprep.mubr.bf16.mxu1 %v625_v50 }
 0x159   : > { %1608 = vmatmul.mubr.bf16.gmra.mrb[4].mxu1 %v626_v49 }
 0x15a   : > { %1648 = vmatpush3.bf16.msra.mxu1 %v1750_v14 }
 0x15b   : > { %1649 = vmatprep.subr.bf16.mxu1 %v1751_v16 }
 0x15e   : > { %1650 = vmatpush3.bf16.msra.mxu1 %v1751_v16 }
 0x15f   : > { %1651 = vmatprep.subr.bf16.mxu1 %v1752_v18 }
 0x162   : > { %1652 = vmatpush3.bf16.msra.mxu1 %v1752_v18 }
 0x163   : > { %1653 = vmatprep.subr.bf16.mxu1 %v1753_v19 }
 0x166   : > { %1654 = vmatpush3.bf16.msra.mxu1 %v1753_v19 }
 0x167   : > { %1655 = vmatprep.subr.bf16.mxu1 %v1754_v20 }
 0x16a   : > { %1656 = vmatpush3.bf16.msra.mxu1 %v1754_v20 }
 0x16b   : > { %1657 = vmatprep.subr.bf16.mxu1 %v1755_v21 }
 0x16e   : > { %1658 = vmatpush3.bf16.msra.mxu1 %v1755_v21 }
 0x224   : > { %v1605_v61 = vpop.f32.mrb[0].mxu1 }
 0x225   : > { %v741_v62 = vadd.f32 %v1605_v61, %v2263_v60  ;;  %v732_v63 = vpop.f32.mrb[1].mxu1 }
 0x226   : > { %v733_v2 = vadd.f32 %v2263_v60, %v732_v63  ;;  %v1606_v3 = vpop.f32.mrb[2].mxu1 }
 0x227   : > { %v765_v4 = vmax.f32 %v741_v62, 0.0  ;;  %v744_v5 = vadd.f32 %v1606_v3, %v2263_v60  ;;  %v735_v6 = vpop.f32.mrb[3].mxu1 }
 0x228   : > { %v763_v7 = vmax.f32 %v733_v2, 0.0  ;;  %v736_v8 = vadd.f32 %v2263_v60, %v735_v6 }
 0x229   : > { %v783_v9 = vrot.slane %v765_v4, 4  ;;  %v766_v10 = vmax.f32 %v744_v5, 0.0 }
 0x22a   : > { %v771_v11 = vrot.slane %v763_v7, 4  ;;  %v764_v12 = vmax.f32 %v736_v8, 0.0 }
 0x22b   : > { %v784_v13 = vadd.f32 %v783_v9, %v765_v4  ;;  %v789_v14 = vrot.slane %v766_v10, 4 }
 0x22c   : > { %v772_v15 = vadd.f32 %v771_v11, %v763_v7  ;;  %v777_v16 = vrot.slane %v764_v12, 4  ;;  %v1609_v17 = vpop.f32.mrb[4].mxu1 }
 0x22d   : > { %v785_v18 = vrot.slane %v784_v13, 2  ;;  %v790_v19 = vadd.f32 %v789_v14, %v766_v10  ;;  %v757_v20 = vadd.f32 %v1609_v17, %v2263_v60  ;;  %v748_v21 = vpop.f32.mrb[5].mxu1 }
 0x22e   : > { %v773_v23 = vrot.slane %v772_v15, 2  ;;  %v778_v24 = vadd.f32 %v777_v16, %v764_v12  ;;  %v749_v25 = vadd.f32 %v2263_v60, %v748_v21  ;;  %v1610_v26 = vpop.f32.mrb[6].mxu1 }
 0x22f   : > { %v786_v27 = vadd.f32 %v785_v18, %v784_v13  ;;  %v791_v28 = vrot.slane %v790_v19, 2  ;;  %v769_v29 = vmax.f32 %v757_v20, 0.0  ;;  %v760_v30 = vadd.f32 %v1610_v26, %v2263_v60  ;;  %v751_v31 = vpop.f32.mrb[7].mxu1 }
 0x230   : > { %v774_v32 = vadd.f32 %v773_v23, %v772_v15  ;;  %v779_v33 = vrot.slane %v778_v24, 2  ;;  %v767_v34 = vmax.f32 %v749_v25, 0.0  ;;  %v752_v35 = vadd.f32 %v2263_v60, %v751_v31 }
 0x231   : > { %v787_v36 = vrot.slane %v786_v27, 1  ;;  %v792_v37 = vadd.f32 %v791_v28, %v790_v19  ;;  %v807_v38 = vrot.slane %v769_v29, 4  ;;  %v770_v39 = vmax.f32 %v760_v30, 0.0 }
 0x232   : > { %v775_v40 = vrot.slane %v774_v32, 1  ;;  %v780_v41 = vadd.f32 %v779_v33, %v778_v24  ;;  %v795_v42 = vrot.slane %v767_v34, 4  ;;  %v768_v43 = vmax.f32 %v752_v35, 0.0 }
 0x233   : > { %v788_v44 = vadd.f32 %v787_v36, %v786_v27  ;;  %v793_v45 = vrot.slane %v792_v37, 1  ;;  %v808_v46 = vadd.f32 %v807_v38, %v769_v29  ;;  %v813_v47 = vrot.slane %v770_v39, 4 }
 0x234   : > { %v776_v48 = vadd.f32 %v775_v40, %v774_v32  ;;  %v781_v49 = vrot.slane %v780_v41, 1  ;;  %v796_v50 = vadd.f32 %v795_v42, %v767_v34  ;;  %v801_v61 = vrot.slane %v768_v43, 4 }
 0x235   : > { %v822_v62 = vmul.f32 0.125, %v788_v44  ;;  %v794_v63 = vadd.f32 %v793_v45, %v792_v37  ;;  %v809_v2 = vrot.slane %v808_v46, 2  ;;  %v814_v3 = vadd.f32 %v813_v47, %v770_v39 }
 0x236   : > { %v820_v4 = vmul.f32 0.125, %v776_v48  ;;  %v782_v5 = vadd.f32 %v781_v49, %v780_v41  ;;  %v797_v6 = vrot.slane %v796_v50, 2  ;;  %v802_v7 = vadd.f32 %v801_v61, %v768_v43  ;;  %v979_v48 = vld [vmem:[%s2122_s15] sm:$0xff]  ;;  %v980_v49 = vld [vmem:[%s2122_s15 + $0x8] sm:$0xff] }
 0x237   : > { %v823_v8 = vmul.f32 0.125, %v794_v63  ;;  %v810_v9 = vadd.f32 %v809_v2, %v808_v46  ;;  %v815_v10 = vrot.slane %v814_v3, 2  ;;  %v830_v15 = vpack.c.bf16 %v822_v62, %v822_v62 }
 0x238   : > { %v828_v11 = vpack.c.bf16 %v820_v4, %v820_v4  ;;  %v821_v12 = vmul.f32 0.125, %v782_v5  ;;  %v798_v13 = vadd.f32 %v797_v6, %v796_v50  ;;  %v803_v14 = vrot.slane %v802_v7, 2  ;;  %v981_v4 = vld [vmem:[%s2122_s15 + $0x10] sm:$0xff]  ;;  %v982_v5 = vld [vmem:[%s2122_s15 + $0x18] sm:$0xff]  ;;  %v983_v6 = vld [vmem:[%s2122_s15 + $0x20] sm:$0xff] }
 0x239   : > { %v811_v16 = vrot.slane %v810_v9, 1  ;;  %v816_v17 = vadd.f32 %v815_v10, %v814_v3  ;;  %v831_v18 = vpack.c.bf16 %v823_v8, %v823_v8  ;;  %v869_v29 = vunpack.c.l.b16 %v830_v15  ;;  %v985_v10 = vld [vmem:[%s2122_s15 + $0x30] sm:$0xff] }
 0x23a   : > { %v829_v19 = vpack.c.bf16 %v821_v12, %v821_v12  ;;  %v799_v20 = vrot.slane %v798_v13, 1  ;;  %v804_v21 = vadd.f32 %v803_v14, %v802_v7  ;;  %v867_v25 = vunpack.c.l.b16 %v828_v11  ;;  %v984_v7 = vld [vmem:[%s2122_s15 + $0x28] sm:$0xff] }
 0x23b   : > { %v812_v23 = vadd.f32 %v811_v16, %v810_v9  ;;  %v817_v24 = vrot.slane %v816_v17, 1  ;;  %v870_v32 = vunpack.c.l.b16 %v831_v18  ;;  %v1517_v2 = vpack.c.bf16 %v980_v49, %v979_v48 }
 0x23c   : > { %v868_v26 = vunpack.c.l.b16 %v829_v19  ;;  %v800_v27 = vadd.f32 %v799_v20, %v798_v13  ;;  %v805_v28 = vrot.slane %v804_v21, 1  ;;  %v1518_v8 = vpack.c.bf16 %v982_v5, %v981_v4 }
 0x23d   : > { %v826_v30 = vmul.f32 0.125, %v812_v23  ;;  %v818_v31 = vadd.f32 %v817_v24, %v816_v17  ;;  %v1519_v9 = vpack.c.bf16 %v984_v7, %v983_v6 }
 0x23e   : > { %v876_v33 = vsel %vm875_vm2, %v868_v26, %v867_v25  ;;  %v824_v34 = vmul.f32 0.125, %v800_v27  ;;  %v806_v35 = vadd.f32 %v805_v28, %v804_v21 }
 0x23f   : > { %v878_v36 = vsel %vm877_vm3, %v869_v29, %v876_v33  ;;  %v827_v37 = vmul.f32 0.125, %v818_v31  ;;  %v834_v41 = vpack.c.bf16 %v826_v30, %v826_v30 }
 0x240   : > { %v832_v38 = vpack.c.bf16 %v824_v34, %v824_v34  ;;  %v880_v39 = vsel %vm879_vm4, %v870_v32, %v878_v36  ;;  %v825_v40 = vmul.f32 0.125, %v806_v35 }
 0x241   : > { %v835_v43 = vpack.c.bf16 %v827_v37, %v827_v37  ;;  %v873_v47 = vunpack.c.l.b16 %v834_v41 }
 0x242   : > { %v871_v42 = vunpack.c.l.b16 %v832_v38  ;;  %v833_v44 = vpack.c.bf16 %v825_v40, %v825_v40 }
 0x243   : > { %v874_v50 = vunpack.c.l.b16 %v835_v43 }
 0x244   : > { %v882_v45 = vsel %vm881_vm5, %v871_v42, %v880_v39  ;;  %v872_v46 = vunpack.c.l.b16 %v833_v44 }
 0x246   : > { %v884_v61 = vsel %vm883_vm6, %v872_v46, %v882_v45 }
 0x247   : > { %v886_v62 = vsel %vm885_vm7, %v873_v47, %v884_v61 }
 0x248   : > { %v888_v63 = vsel %vm887_vm8, %v874_v50, %v886_v62 }
 0x249   : > { %v889_v3 = vpack.c.b16 %v888_v63, %v888_v63 }
 0x24b   : > { %1628 = vmatmul.mubr.bf16.vlgmr.msra.gmra.mrb[8].mxu0 %v889_v3 }
 0x24c   : > { %1632 = vmatpush3.bf16.msra.mxu0 %v2135_v0  ;;  %1635 = vmatprep.mubr.msk.bf16.mxu0 %vm537_vm0, %v1517_v2  ;;  %v986_v0 = vld [vmem:[%s2122_s15 + $0x38] sm:$0xff] }
 0x24d   : > { %1633 = vmatprep.subr.bf16.mxu0 %v2140_v1  ;;  %v1520_v11 = vpack.c.bf16 %v986_v0, %v985_v10 }
 0x250   : > { %1634 = vmatpush3.bf16.msra.mxu0 %v2140_v1  ;;  %v2316_v1 = vld [vmem:[%s2383_s8] ss:$0 sm:$0xff] }
 0x251   : > { %1667 = vmatprep.subr.bf16.mxu0 %v1894_v52 }
 0x253   : > { %1636 = vmatmul.mubr.msk.bf16.vlgmr.msra.gmra.mrb[12].mxu0 %vm537_vm0, %v1518_v8 }
 0x254   : > { %1639 = vmatprep.mubr.msk.bf16.mxu0 %vm537_vm0, %v1519_v9  ;;  %1668 = vmatpush3.bf16.msra.mxu0 %v2204_v51 }
 0x255   : > { %1669 = vmatprep.subr.bf16.mxu0 %v1894_v52 }
 0x258   : > { %1670 = vmatpush3.bf16.msra.mxu0 %v2212_v53 }
 0x259   : > { %1671 = vmatprep.subr.bf16.mxu0 %v1894_v52 }
 0x25b   : > { %1640 = vmatmul.mubr.msk.bf16.gmra.mrb[16].mxu0 %vm537_vm0, %v1520_v11 }
 0x25c   : > { %1672 = vmatpush3.bf16.msra.mxu0 %v2219_v54  ;;  %1683 = vmatprep.mubr.msk.bf16.mxu0 %vm1895_vm1, %v1894_v52 }
 0x25d   : > { %1673 = vmatprep.subr.bf16.mxu0 %v1894_v52 }
 0x260   : > { %1674 = vmatpush3.bf16.msra.mxu0 %v2226_v55 }
 0x261   : > { %1675 = vmatprep.subr.bf16.mxu0 %v1894_v52 }
 0x264   : > { %1676 = vmatpush3.bf16.msra.mxu0 %v2233_v56 }
 0x265   : > { %1677 = vmatprep.subr.bf16.mxu0 %v1894_v52 }
 0x268   : > { %1678 = vmatpush3.bf16.msra.mxu0 %v2240_v57 }
 0x269   : > { %1679 = vmatprep.subr.bf16.mxu0 %v1894_v52 }
 0x26c   : > { %1680 = vmatpush3.bf16.msra.mxu0 %v2247_v58 }
 0x26d   : > { %1681 = vmatprep.subr.bf16.mxu0 %v1894_v52 }
 0x270   : > { %1682 = vmatpush3.bf16.msra.mxu0 %v2254_v59 }
 0x31e   : > { %v973_v51 = vpop.f32.mrb[8].mxu0 }
 0x31f   : > { %v2319_v53 = vadd.f32 %v2316_v1, %v973_v51  ;;  %v1629_v54 = vpop.f32.mrb[9].mxu0 }
 0x320   : > { %v976_v55 = vpop.f32.mrb[10].mxu0 }
 0x321   : > { %v1630_v56 = vpop.f32.mrb[11].mxu0  ;;  %v1310_v57 = vmul.f32 %v2319_v53, %v2319_v53 }
 0x323   : > { %v1311_v58 = vsel %vm537_vm0, %v1310_v57, 0.0 }
 0x324   : > { %1312 = vadd.xlane.f32.xlu0 %v1311_v58 }
 0x326   : > { %v1637_v52 = vpop.f32.mrb[12].mxu0 }
 0x327   : > { %v1070_v59 = vadd.f32 %v1637_v52, %v2189_v22  ;;  %v1061_v12 = vpop.f32.mrb[13].mxu0 }
 0x328   : > { %v1062_v13 = vadd.f32 %v2189_v22, %v1061_v12  ;;  %v1638_v14 = vpop.f32.mrb[14].mxu0 }
 0x329   : > { %v1073_v15 = vadd.f32 %v1638_v14, %v2189_v22  ;;  %v1064_v16 = vpop.f32.mrb[15].mxu0  ;;  %v1094_v18 = vmax.f32 %v1070_v59, 0.0 }
 0x32a   : > { %v1065_v17 = vadd.f32 %v2189_v22, %v1064_v16  ;;  %v1092_v20 = vmax.f32 %v1062_v13, 0.0 }
 0x32b   : > { %v1095_v19 = vmax.f32 %v1073_v15, 0.0 }
 0x32c   : > { %v1093_v21 = vmax.f32 %v1065_v17, 0.0 }
 0x32d   : > { %v1101_v23 = vpack.c.bf16 %v1095_v19, %v1094_v18 }
 0x32e   : > { %v1100_v24 = vpack.c.bf16 %v1093_v21, %v1092_v20  ;;  %v1641_v25 = vpop.f32.mrb[16].mxu0 }
 0x32f   : > { %v1086_v26 = vadd.f32 %v1641_v25, %v2189_v22  ;;  %v1077_v27 = vpop.f32.mrb[17].mxu0 }
 0x330   : > { %v1078_v28 = vadd.f32 %v2189_v22, %v1077_v27  ;;  %v1642_v29 = vpop.f32.mrb[18].mxu0  ;;  %1659 = vmatprep.mubr.bf16.mxu1 %v1100_v24 }
 0x331   : > { %v1089_v30 = vadd.f32 %v1642_v29, %v2189_v22  ;;  %v1080_v31 = vpop.f32.mrb[19].mxu0  ;;  %1660 = vmatmul.mubr.bf16.vlgmr.msra.gmra.mrb[8].mxu1 %v1101_v23  ;;  %v1098_v33 = vmax.f32 %v1086_v26, 0.0 }
 0x332   : > { %v1081_v32 = vadd.f32 %v2189_v22, %v1080_v31  ;;  %v1096_v35 = vmax.f32 %v1078_v28, 0.0 }
 0x333   : > { %v1099_v34 = vmax.f32 %v1089_v30, 0.0 }
 0x334   : > { %v1097_v36 = vmax.f32 %v1081_v32, 0.0 }
 0x335   : > { %v1103_v37 = vpack.c.bf16 %v1099_v34, %v1098_v33 }
 0x336   : > { %v1102_v38 = vpack.c.bf16 %v1097_v36, %v1096_v35 }
 0x338   : > { %1663 = vmatprep.mubr.bf16.mxu1 %v1102_v38 }
 0x339   : > { %1664 = vmatmul.mubr.bf16.gmra.mrb[12].mxu1 %v1103_v37 }
 0x404   : > { %v1661_v39 = vpop.f32.mrb[8].mxu1 }
 0x405   : > { %v1147_v40 = vadd.f32 %v1661_v39, %v2263_v60  ;;  %v1138_v41 = vpop.f32.mrb[9].mxu1 }
 0x406   : > { %v1139_v42 = vadd.f32 %v2263_v60, %v1138_v41  ;;  %v1662_v43 = vpop.f32.mrb[10].mxu1 }
 0x407   : > { %v1171_v44 = vmax.f32 %v1147_v40, 0.0  ;;  %v1150_v45 = vadd.f32 %v1662_v43, %v2263_v60  ;;  %v1141_v46 = vpop.f32.mrb[11].mxu1 }
 0x408   : > { %v1169_v22 = vmax.f32 %v1139_v42, 0.0  ;;  %v1142_v47 = vadd.f32 %v2263_v60, %v1141_v46 }
 0x409   : > { %v1189_v48 = vrot.slane %v1171_v44, 4  ;;  %v1172_v49 = vmax.f32 %v1150_v45, 0.0 }
 0x40a   : > { %v1177_v50 = vrot.slane %v1169_v22, 4  ;;  %v1170_v61 = vmax.f32 %v1142_v47, 0.0 }
 0x40b   : > { %v1190_v62 = vadd.f32 %v1189_v48, %v1171_v44  ;;  %v1195_v63 = vrot.slane %v1172_v49, 4 }
 0x40c   : > { %v1178_v2 = vadd.f32 %v1177_v50, %v1169_v22  ;;  %v1183_v3 = vrot.slane %v1170_v61, 4  ;;  %v1665_v4 = vpop.f32.mrb[12].mxu1 }
 0x40d   : > { %v1191_v5 = vrot.slane %v1190_v62, 2  ;;  %v1196_v6 = vadd.f32 %v1195_v63, %v1172_v49  ;;  %v1163_v7 = vadd.f32 %v1665_v4, %v2263_v60  ;;  %v1154_v8 = vpop.f32.mrb[13].mxu1 }
 0x40e   : > { %v1179_v9 = vrot.slane %v1178_v2, 2  ;;  %v1184_v10 = vadd.f32 %v1183_v3, %v1170_v61  ;;  %v1155_v0 = vadd.f32 %v2263_v60, %v1154_v8  ;;  %v1666_v11 = vpop.f32.mrb[14].mxu1 }
 0x40f   : > { %v1192_v51 = vadd.f32 %v1191_v5, %v1190_v62  ;;  %v1197_v54 = vrot.slane %v1196_v6, 2  ;;  %v1175_v55 = vmax.f32 %v1163_v7, 0.0  ;;  %v1166_v56 = vadd.f32 %v1666_v11, %v2263_v60  ;;  %v1157_v57 = vpop.f32.mrb[15].mxu1 }
 0x410   : > { %v1180_v58 = vadd.f32 %v1179_v9, %v1178_v2  ;;  %v1185_v52 = vrot.slane %v1184_v10, 2  ;;  %v1173_v59 = vmax.f32 %v1155_v0, 0.0  ;;  %v1158_v12 = vadd.f32 %v2263_v60, %v1157_v57 }
 0x411   : > { %v1193_v13 = vrot.slane %v1192_v51, 1  ;;  %v1198_v14 = vadd.f32 %v1197_v54, %v1196_v6  ;;  %v1213_v15 = vrot.slane %v1175_v55, 4  ;;  %v1176_v16 = vmax.f32 %v1166_v56, 0.0 }
 0x412   : > { %v1181_v17 = vrot.slane %v1180_v58, 1  ;;  %v1186_v18 = vadd.f32 %v1185_v52, %v1184_v10  ;;  %v1201_v19 = vrot.slane %v1173_v59, 4  ;;  %v1174_v20 = vmax.f32 %v1158_v12, 0.0 }
 0x413   : > { %v1194_v21 = vadd.f32 %v1193_v13, %v1192_v51  ;;  %v1199_v23 = vrot.slane %v1198_v14, 1  ;;  %v1214_v24 = vadd.f32 %v1213_v15, %v1175_v55  ;;  %v1219_v25 = vrot.slane %v1176_v16, 4 }
 0x414   : > { %v1182_v26 = vadd.f32 %v1181_v17, %v1180_v58  ;;  %v1187_v27 = vrot.slane %v1186_v18, 1  ;;  %v1202_v28 = vadd.f32 %v1201_v19, %v1173_v59  ;;  %v1207_v29 = vrot.slane %v1174_v20, 4 }
 0x415   : > { %v1227_v30 = vmul.f32 0.125, %v1194_v21  ;;  %v1200_v31 = vadd.f32 %v1199_v23, %v1198_v14  ;;  %v1215_v32 = vrot.slane %v1214_v24, 2  ;;  %v1220_v60 = vadd.f32 %v1219_v25, %v1176_v16 }
 0x416   : > { %v1225_v33 = vmul.f32 0.125, %v1182_v26  ;;  %v1188_v34 = vadd.f32 %v1187_v27, %v1186_v18  ;;  %v1203_v35 = vrot.slane %v1202_v28, 2  ;;  %v1208_v36 = vadd.f32 %v1207_v29, %v1174_v20 }
 0x417   : > { %v1228_v37 = vmul.f32 0.125, %v1200_v31  ;;  %v1216_v38 = vadd.f32 %v1215_v32, %v1214_v24  ;;  %v1221_v39 = vrot.slane %v1220_v60, 2  ;;  %v1235_v44 = vpack.c.bf16 %v1227_v30, %v1227_v30 }
 0x418   : > { %v1233_v40 = vpack.c.bf16 %v1225_v33, %v1225_v33  ;;  %v1226_v41 = vmul.f32 0.125, %v1188_v34  ;;  %v1204_v42 = vadd.f32 %v1203_v35, %v1202_v28  ;;  %v1209_v43 = vrot.slane %v1208_v36, 2 }
 0x419   : > { %v1217_v45 = vrot.slane %v1216_v38, 1  ;;  %v1222_v46 = vadd.f32 %v1221_v39, %v1220_v60  ;;  %v1236_v22 = vpack.c.bf16 %v1228_v37, %v1228_v37  ;;  %v1251_v4 = vunpack.c.l.b16 %v1235_v44 }
 0x41a   : > { %v1234_v47 = vpack.c.bf16 %v1226_v41, %v1226_v41  ;;  %v1205_v48 = vrot.slane %v1204_v42, 1  ;;  %v1210_v49 = vadd.f32 %v1209_v43, %v1208_v36  ;;  %v1249_v62 = vunpack.c.l.b16 %v1233_v40 }
 0x41b   : > { %v1218_v50 = vadd.f32 %v1217_v45, %v1216_v38  ;;  %v1223_v61 = vrot.slane %v1222_v46, 1  ;;  %v1252_v7 = vunpack.c.l.b16 %v1236_v22  ;;  %v1334_v36 = vstv %s1508_s16 }
 0x41c   : > { %v1250_v63 = vunpack.c.l.b16 %v1234_v47  ;;  %v1206_v2 = vadd.f32 %v1205_v48, %v1204_v42  ;;  %v1211_v3 = vrot.slane %v1210_v49, 1  ;;  %v1331_v38 = vstv %s1330_s30 }
 0x41d   : > { %v1231_v5 = vmul.f32 0.125, %v1218_v50  ;;  %v1224_v6 = vadd.f32 %v1223_v61, %v1222_v46  ;;  %v1338_v43 = vstv %s1337_s12 }
 0x41e   : > { %v1257_v8 = vsel %vm875_vm2, %v1250_v63, %v1249_v62  ;;  %v1229_v9 = vmul.f32 0.125, %v1206_v2  ;;  %v1212_v10 = vadd.f32 %v1211_v3, %v1210_v49 }
 0x41f   : > { %v1258_v0 = vsel %vm877_vm3, %v1251_v4, %v1257_v8  ;;  %v1232_v11 = vmul.f32 0.125, %v1224_v6  ;;  %v1239_v56 = vpack.c.bf16 %v1231_v5, %v1231_v5 }
 0x420   : > { %v1237_v51 = vpack.c.bf16 %v1229_v9, %v1229_v9  ;;  %v1259_v54 = vsel %vm879_vm4, %v1252_v7, %v1258_v0  ;;  %v1230_v55 = vmul.f32 0.125, %v1212_v10 }
 0x421   : > { %v1240_v58 = vpack.c.bf16 %v1232_v11, %v1232_v11  ;;  %v1255_v13 = vunpack.c.l.b16 %v1239_v56 }
 0x422   : > { %v1253_v57 = vunpack.c.l.b16 %v1237_v51  ;;  %v1238_v52 = vpack.c.bf16 %v1230_v55, %v1230_v55 }
 0x423   : > { %v1256_v14 = vunpack.c.l.b16 %v1240_v58 }
 0x424   : > { %v1260_v59 = vsel %vm881_vm5, %v1253_v57, %v1259_v54  ;;  %v1254_v12 = vunpack.c.l.b16 %v1238_v52 }
 0x426   : > { %v1261_v15 = vsel %vm883_vm6, %v1254_v12, %v1260_v59 }
 0x427   : > { %v1262_v16 = vsel %vm885_vm7, %v1255_v13, %v1261_v15 }
 0x428   : > { %v1263_v17 = vsel %vm887_vm8, %v1256_v14, %v1262_v16 }
 0x429   : > { %v1264_v18 = vpack.c.b16 %v1263_v17, %v1263_v17 }
 0x42b   : > { %1684 = vmatmul.mubr.bf16.vlgmr.msra.gmra.mrb[20].mxu0 %v1264_v18 }
 0x4fe   : > { %v1300_v19 = vpop.f32.mrb[20].mxu0 }
 0x4ff   : > { %v1301_v20 = vadd.f32 %v2316_v1, %v1300_v19  ;;  %v1685_v21 = vpop.f32.mrb[21].mxu0  ;;  %v1323_v1 = vld [vmem:[%s472_s25] sm:$0xff] }
 0x500   : > { %v1303_v23 = vpop.f32.mrb[22].mxu0  ;;  %v1507_v29 = vmul.f32 -1.442695, %v1323_v1 }
 0x501   : > { %v1686_v24 = vpop.f32.mrb[23].mxu0  ;;  %v1315_v25 = vmul.f32 %v1301_v20, %v1301_v20  ;;  %v1306_v26 = vmul.f32 %v1301_v20, %v2319_v53  ;;  %v1313_v53 = vpop.xlane.xlu0 %1312 }
 0x502   : > { %1764 = vpow2.f32 %v1507_v29  ;;  %v1314_v60 = vmax.f32 %v1313_v53, 1e-16 }
 0x503   : > { %v1316_v27 = vsel %vm537_vm0, %v1315_v25, 0.0  ;;  %v1307_v28 = vsel %vm537_vm0, %v1306_v26, 0.0 }
 0x504   : > { %1317 = vadd.xlane.f32.xlu0 %v1316_v27  ;;  %1308 = vadd.xlane.f32.xlu1 %v1307_v28 }
 0x50c   : > { %v1765_v30 = vpop.eup %1764 }
 0x50d   : > { %v1327_v31 = vadd.f32 1.0, %v1765_v30 }
 0x50f   : > { %1766 = vrcp.f32 %v1327_v31 }
 0x519   : > { %v1767_v35 = vpop.eup %1766 }
 0x51a   : > { %v1335_v41 = vmul.f32 %v1767_v35, %v1334_v36 }
 0x591   : > { %v1318_v32 = vpop.xlane.xlu0 %1317  ;;  %v1309_v39 = vpop.xlane.xlu1 %1308 }
 0x592   : > { %v1319_v33 = vmax.f32 %v1318_v32, 1e-16 }
 0x594   : > { %v1320_v34 = vmul.f32 %v1319_v33, %v1314_v60 }
 0x596   : > { %1768 = vrsqrt.f32 %v1320_v34 }
 0x5a0   : > { %v1769_v37 = vpop.eup %1768 }
 0x5a1   : > { %v1322_v40 = vmul.f32 %v1769_v37, %v1309_v39 }
 0x5a3   : > { %v1332_v42 = vmul.f32 %v1331_v38, %v1322_v40 }
 0x5a5   : > { %v1336_v44 = vadd.f32 %v1335_v41, %v1332_v42 }
 0x5a7   : > { %v1339_v45 = vadd.f32 %v1338_v43, %v1336_v44 }
 0x5a9   : > { %1341 = vst.msk [vmem:[%s476_s21] sm:$0xff] %vm1340_vm9, %v1339_v45 }
 0x5aa PF: > { %s2404_s22 = sld [smem:[#allocation12_spill]]  ;;  %s2405_s21 = sld [smem:[#allocation13_spill]] }
 0x5ab   : > { %p26_p13 = scmp.ge.s32.totalorder %s1981_s23, 4   ;;  %s2406_s19 = smov %s1879_s20 }
 0x5ad   :  { %28 = sbr.rel (!%p26_p13) target bundleno = 10 (0xa), region = 125 }
 0x5b0   : > { %s2407_s20 = smov %s2404_s22  ;;  %s2408_s22 = smov %s1981_s23 }
 0x5b4   :  { %1361 = vsyncpa [#allocation4], 1 }
 0x5b5   :  { %1363 = vsyncpa [#allocation4 + $0x1], 1 }
 0x5b6   :  { %1364 = vsyncpa [#allocation7], 1 }
 0x5b7   :  { %1366 = vsyncpa [#allocation7 + $0x1], 1 }
 0x5b8   :  { %1367 = vsyncpa [#allocation5], 1 }
 0x5b9   :  { %1369 = vsyncpa [#allocation5 + $0x1], 1 }

</bundles_post_ra>
